<compile_context>
chip_gen: v7x
topology: tpu7x:2x2x1
jax: 0.10.0
libtpu: 0.0.40
codegen_flags: <defaults>
</compile_context>

<pallas_src>
import jax
import jax.numpy as jnp
import numpy as np
from jax.experimental import pallas as pl
from jax.experimental.pallas import tpu as pltpu

INPUT_SIZE = 128
HIDDEN = 64
NUM_LAYERS = 3

# On v6e/v7x this can be set to jnp.bfloat16 to halve MXU passes / weight bytes
# (state + nonlinearities stay f32), at the cost of no longer matching the f32
# reference to 1e-5.  Kept at f32 so numerics match PyTorch/lax.scan exactly.
MATMUL_DTYPE = jnp.float32


def _lstm_stack_kernel(x_ref, *rest):
    """Whole 3-layer LSTM over the full sequence, everything VMEM-resident.

    x_ref:  (T, B, 128) time-major input
    rest:   for each layer: wih (Din, 4H), whh (H, 4H), b (1, 4H); then out_ref
    out_ref:(T, B, H) hidden outputs of the last layer
    """
    out_ref = rest[-1]
    w_refs = rest[:-1]
    num_layers = len(w_refs) // 3

    T, B, _ = x_ref.shape
    H = HIDDEN

    def run_layer(xs, wi_ref, wh_ref, b_ref):
        wi = wi_ref[...].astype(MATMUL_DTYPE)   # (Din, 4H) — loaded once per layer
        wh = wh_ref[...].astype(MATMUL_DTYPE)   # (H, 4H)
        b = b_ref[...]                          # (1, 4H), single lane-dense add
        h = jnp.zeros((B, H), jnp.float32)
        c = jnp.zeros((B, H), jnp.float32)
        outs = []
        for x_t in xs:                          # static unrolled time loop
            gates = (jnp.dot(x_t.astype(MATMUL_DTYPE), wi,
                             preferred_element_type=jnp.float32)
                     + jnp.dot(h.astype(MATMUL_DTYPE), wh,
                               preferred_element_type=jnp.float32)
                     + b)                       # (B, 4H), gate order i,f,g,o
            i_g = jax.nn.sigmoid(gates[:, 0 * H:1 * H])
            f_g = jax.nn.sigmoid(gates[:, 1 * H:2 * H])
            g_g = jnp.tanh(gates[:, 2 * H:3 * H])
            o_g = jax.nn.sigmoid(gates[:, 3 * H:4 * H])
            c = f_g * c + i_g * g_g
            h = o_g * jnp.tanh(c)
            outs.append(h)
        return outs

    xs = [x_ref[t].astype(jnp.float32) for t in range(T)]
    for layer in range(num_layers):
        wi_ref, wh_ref, b_ref = w_refs[3 * layer: 3 * layer + 3]
        xs = run_layer(xs, wi_ref, wh_ref, b_ref)

    # Single writeback of the final activations (no per-step HBM stores).
    for t in range(T):
        out_ref[t] = xs[t].astype(out_ref.dtype)


def _lstm_stack(x_tm, flat_params):
    """x_tm: (T, B, 128) time-major.  Returns (T, B, H)."""
    T, B, _ = x_tm.shape
    n_in = 1 + len(flat_params)
    vmem = lambda: pl.BlockSpec(memory_space=pltpu.MemorySpace.VMEM)
    return pl.pallas_call(
        _lstm_stack_kernel,
        out_shape=jax.ShapeDtypeStruct((T, B, HIDDEN), jnp.float32),
        in_specs=[vmem() for _ in range(n_in)],
        out_specs=vmem(),
    )(x_tm, *flat_params)


def init_params(key, num_layers=NUM_LAYERS, input_size=INPUT_SIZE, hidden=HIDDEN):
    """Deterministic params in PyTorch nn.LSTM shapes, converted to fused layout."""
    bound = 1.0 / np.sqrt(hidden)
    params = []
    for layer in range(num_layers):
        d_in = input_size if layer == 0 else hidden
        key, k1, k2, k3, k4 = jax.random.split(key, 5)
        w_ih = jax.random.uniform(k1, (4 * hidden, d_in), jnp.float32, -bound, bound)
        w_hh = jax.random.uniform(k2, (4 * hidden, hidden), jnp.float32, -bound, bound)
        b_ih = jax.random.uniform(k3, (4 * hidden,), jnp.float32, -bound, bound)
        b_hh = jax.random.uniform(k4, (4 * hidden,), jnp.float32, -bound, bound)
        # Fused kernel layout: Wih (d_in, 4H), Whh (H, 4H), b (1, 4H).
        # PyTorch rows are [i; f; g; o] blocks, so a plain transpose keeps the
        # i,f,g,o column order the kernel slices on.
        wih_k = w_ih.T
        whh_k = w_hh.T
        b_k = (b_ih + b_hh).reshape(1, 4 * hidden)
        params.append((wih_k, whh_k, b_k))
    return params


@jax.jit
def lstm2_forward(features, params):
    """features: (B, T, 128) batch-first like the PyTorch module. Returns (B, T, 64)."""
    flat = [a for layer in params for a in layer]
    x_tm = jnp.transpose(features, (1, 0, 2)).astype(jnp.float32)  # (T, B, D)
    out_tm = _lstm_stack(x_tm, flat)                               # (T, B, H)
    return jnp.transpose(out_tm, (1, 0, 2))                        # (B, T, H)


def _reference_lstm2(features, params):
    """Pure-JAX reference (lax.scan) for verification, same fused-weight layout."""
    x = jnp.transpose(features, (1, 0, 2)).astype(jnp.float32)  # (T, B, D)
    B = x.shape[1]
    H = HIDDEN
    for (wih, whh, b) in params:
        def step(carry, x_t):
            h, c = carry
            gates = x_t @ wih + h @ whh + b
            i_g = jax.nn.sigmoid(gates[:, 0 * H:1 * H])
            f_g = jax.nn.sigmoid(gates[:, 1 * H:2 * H])
            g_g = jnp.tanh(gates[:, 2 * H:3 * H])
            o_g = jax.nn.sigmoid(gates[:, 3 * H:4 * H])
            c_new = f_g * c + i_g * g_g
            h_new = o_g * jnp.tanh(c_new)
            return (h_new, c_new), h_new

        init = (jnp.zeros((B, H), jnp.float32), jnp.zeros((B, H), jnp.float32))
        _, x = jax.lax.scan(step, init, x)
    return jnp.transpose(x, (1, 0, 2))


if __name__ == "__main__":
    key = jax.random.PRNGKey(0)
    key, pkey, xkey = jax.random.split(key, 3)

    params = init_params(pkey)
    # Same shape as the PyTorch sample_input: torch.rand(size=(4, 5, 128))
    features = jax.random.uniform(xkey, (4, 5, 128), jnp.float32)

    out = lstm2_forward(features, params)
    out = jax.block_until_ready(out)

    assert out.shape == (4, 5, HIDDEN), out.shape

    ref = _reference_lstm2(features, params)
    np.testing.assert_allclose(np.asarray(out), np.asarray(ref), atol=1e-5, rtol=1e-5)

    # NOTE: MXU utilization is inherently low at B=4 (M=4 rows); stacking more
    # sequences into the batch is the only lever for that — everything else
    # here removes fixed overhead (launches, grid steps, tiny masked stores).
    print("KERNEL_OK")
</pallas_src>

<mosaic_0001>
module attributes {stable_mosaic.version = 11 : i64} {
  func.func @_lstm_stack_kernel(%arg0: memref<5x4x128xf32, #tpu.memory_space<vmem>>, %arg1: memref<128x256xf32, #tpu.memory_space<vmem>>, %arg2: memref<64x256xf32, #tpu.memory_space<vmem>>, %arg3: memref<1x256xf32, #tpu.memory_space<vmem>>, %arg4: memref<64x256xf32, #tpu.memory_space<vmem>>, %arg5: memref<64x256xf32, #tpu.memory_space<vmem>>, %arg6: memref<1x256xf32, #tpu.memory_space<vmem>>, %arg7: memref<64x256xf32, #tpu.memory_space<vmem>>, %arg8: memref<64x256xf32, #tpu.memory_space<vmem>>, %arg9: memref<1x256xf32, #tpu.memory_space<vmem>>, %arg10: memref<5x4x64xf32, #tpu.memory_space<vmem>>) attributes {dimension_semantics = [], scalar_prefetch = 0 : i64, scratch_operands = 0 : i64, tpu.core_type = #tpu.core_type<tc>} {
    %c0 = arith.constant 0 : index
    %c0_0 = arith.constant 0 : index
    %c0_1 = arith.constant 0 : index
    %0 = vector.load %arg0[%c0, %c0_0, %c0_1] : memref<5x4x128xf32, #tpu.memory_space<vmem>>, vector<1x4x128xf32>
    %1 = vector.shape_cast %0 : vector<1x4x128xf32> to vector<4x128xf32>
    %c1 = arith.constant 1 : index
    %c0_2 = arith.constant 0 : index
    %c0_3 = arith.constant 0 : index
    %2 = vector.load %arg0[%c1, %c0_2, %c0_3] : memref<5x4x128xf32, #tpu.memory_space<vmem>>, vector<1x4x128xf32>
    %3 = vector.shape_cast %2 : vector<1x4x128xf32> to vector<4x128xf32>
    %c2 = arith.constant 2 : index
    %c0_4 = arith.constant 0 : index
    %c0_5 = arith.constant 0 : index
    %4 = vector.load %arg0[%c2, %c0_4, %c0_5] : memref<5x4x128xf32, #tpu.memory_space<vmem>>, vector<1x4x128xf32>
    %5 = vector.shape_cast %4 : vector<1x4x128xf32> to vector<4x128xf32>
    %c3 = arith.constant 3 : index
    %c0_6 = arith.constant 0 : index
    %c0_7 = arith.constant 0 : index
    %6 = vector.load %arg0[%c3, %c0_6, %c0_7] : memref<5x4x128xf32, #tpu.memory_space<vmem>>, vector<1x4x128xf32>
    %7 = vector.shape_cast %6 : vector<1x4x128xf32> to vector<4x128xf32>
    %c4 = arith.constant 4 : index
    %c0_8 = arith.constant 0 : index
    %c0_9 = arith.constant 0 : index
    %8 = vector.load %arg0[%c4, %c0_8, %c0_9] : memref<5x4x128xf32, #tpu.memory_space<vmem>>, vector<1x4x128xf32>
    %9 = vector.shape_cast %8 : vector<1x4x128xf32> to vector<4x128xf32>
    %c0_10 = arith.constant 0 : index
    %c0_11 = arith.constant 0 : index
    %10 = vector.load %arg1[%c0_10, %c0_11] : memref<128x256xf32, #tpu.memory_space<vmem>>, vector<128x256xf32>
    %c0_12 = arith.constant 0 : index
    %c0_13 = arith.constant 0 : index
    %11 = vector.load %arg2[%c0_12, %c0_13] : memref<64x256xf32, #tpu.memory_space<vmem>>, vector<64x256xf32>
    %c0_14 = arith.constant 0 : index
    %c0_15 = arith.constant 0 : index
    %12 = vector.load %arg3[%c0_14, %c0_15] : memref<1x256xf32, #tpu.memory_space<vmem>>, vector<1x256xf32>
    %cst = arith.constant 0.000000e+00 : f32
    %13 = vector.broadcast %cst : f32 to vector<4x64xf32>
    %cst_16 = arith.constant 0.000000e+00 : f32
    %14 = vector.broadcast %cst_16 : f32 to vector<4x64xf32>
    %cst_17 = arith.constant dense<0.000000e+00> : vector<4x256xf32>
    %15 = tpu.matmul %1, %10, %cst_17 {dimension_numbers = #tpu.dot_dimension_numbers<[1], [0], [0], [1], [0, 0, 1, 1], [], []>} : vector<4x128xf32>, vector<128x256xf32>, vector<4x256xf32> -> vector<4x256xf32>
    %cst_18 = arith.constant dense<0.000000e+00> : vector<4x256xf32>
    %16 = tpu.matmul %13, %11, %cst_18 {dimension_numbers = #tpu.dot_dimension_numbers<[1], [0], [0], [1], [0, 0, 1, 1], [], []>} : vector<4x64xf32>, vector<64x256xf32>, vector<4x256xf32> -> vector<4x256xf32>
    %17 = arith.addf %15, %16 : vector<4x256xf32>
    %18 = vector.broadcast %12 : vector<1x256xf32> to vector<4x256xf32>
    %19 = arith.addf %17, %18 : vector<4x256xf32>
    %20 = vector.extract_strided_slice %19 {offsets = [0, 0], sizes = [4, 64], strides = [1, 1]} : vector<4x256xf32> to vector<4x64xf32>
    %21 = arith.negf %20 : vector<4x64xf32>
    %22 = math.exp %21 : vector<4x64xf32>
    %cst_19 = arith.constant 1.000000e+00 : f32
    %23 = vector.broadcast %cst_19 : f32 to vector<4x64xf32>
    %24 = arith.addf %23, %22 : vector<4x64xf32>
    %25 = arith.divf %23, %24 : vector<4x64xf32>
    %26 = vector.extract_strided_slice %19 {offsets = [0, 64], sizes = [4, 64], strides = [1, 1]} : vector<4x256xf32> to vector<4x64xf32>
    %27 = arith.negf %26 : vector<4x64xf32>
    %28 = math.exp %27 : vector<4x64xf32>
    %cst_20 = arith.constant 1.000000e+00 : f32
    %29 = vector.broadcast %cst_20 : f32 to vector<4x64xf32>
    %30 = arith.addf %29, %28 : vector<4x64xf32>
    %31 = arith.divf %29, %30 : vector<4x64xf32>
    %32 = vector.extract_strided_slice %19 {offsets = [0, 128], sizes = [4, 64], strides = [1, 1]} : vector<4x256xf32> to vector<4x64xf32>
    %33 = math.tanh %32 : vector<4x64xf32>
    %34 = vector.extract_strided_slice %19 {offsets = [0, 192], sizes = [4, 64], strides = [1, 1]} : vector<4x256xf32> to vector<4x64xf32>
    %35 = arith.negf %34 : vector<4x64xf32>
    %36 = math.exp %35 : vector<4x64xf32>
    %cst_21 = arith.constant 1.000000e+00 : f32
    %37 = vector.broadcast %cst_21 : f32 to vector<4x64xf32>
    %38 = arith.addf %37, %36 : vector<4x64xf32>
    %39 = arith.divf %37, %38 : vector<4x64xf32>
    %40 = arith.mulf %31, %14 : vector<4x64xf32>
    %41 = arith.mulf %25, %33 : vector<4x64xf32>
    %42 = arith.addf %40, %41 : vector<4x64xf32>
    %43 = math.tanh %42 : vector<4x64xf32>
    %44 = arith.mulf %39, %43 : vector<4x64xf32>
    %cst_22 = arith.constant dense<0.000000e+00> : vector<4x256xf32>
    %45 = tpu.matmul %3, %10, %cst_22 {dimension_numbers = #tpu.dot_dimension_numbers<[1], [0], [0], [1], [0, 0, 1, 1], [], []>} : vector<4x128xf32>, vector<128x256xf32>, vector<4x256xf32> -> vector<4x256xf32>
    %cst_23 = arith.constant dense<0.000000e+00> : vector<4x256xf32>
    %46 = tpu.matmul %44, %11, %cst_23 {dimension_numbers = #tpu.dot_dimension_numbers<[1], [0], [0], [1], [0, 0, 1, 1], [], []>} : vector<4x64xf32>, vector<64x256xf32>, vector<4x256xf32> -> vector<4x256xf32>
    %47 = arith.addf %45, %46 : vector<4x256xf32>
    %48 = vector.broadcast %12 : vector<1x256xf32> to vector<4x256xf32>
    %49 = arith.addf %47, %48 : vector<4x256xf32>
    %50 = vector.extract_strided_slice %49 {offsets = [0, 0], sizes = [4, 64], strides = [1, 1]} : vector<4x256xf32> to vector<4x64xf32>
    %51 = arith.negf %50 : vector<4x64xf32>
    %52 = math.exp %51 : vector<4x64xf32>
    %cst_24 = arith.constant 1.000000e+00 : f32
    %53 = vector.broadcast %cst_24 : f32 to vector<4x64xf32>
    %54 = arith.addf %53, %52 : vector<4x64xf32>
    %55 = arith.divf %53, %54 : vector<4x64xf32>
    %56 = vector.extract_strided_slice %49 {offsets = [0, 64], sizes = [4, 64], strides = [1, 1]} : vector<4x256xf32> to vector<4x64xf32>
    %57 = arith.negf %56 : vector<4x64xf32>
    %58 = math.exp %57 : vector<4x64xf32>
    %cst_25 = arith.constant 1.000000e+00 : f32
    %59 = vector.broadcast %cst_25 : f32 to vector<4x64xf32>
    %60 = arith.addf %59, %58 : vector<4x64xf32>
    %61 = arith.divf %59, %60 : vector<4x64xf32>
    %62 = vector.extract_strided_slice %49 {offsets = [0, 128], sizes = [4, 64], strides = [1, 1]} : vector<4x256xf32> to vector<4x64xf32>
    %63 = math.tanh %62 : vector<4x64xf32>
    %64 = vector.extract_strided_slice %49 {offsets = [0, 192], sizes = [4, 64], strides = [1, 1]} : vector<4x256xf32> to vector<4x64xf32>
    %65 = arith.negf %64 : vector<4x64xf32>
    %66 = math.exp %65 : vector<4x64xf32>
    %cst_26 = arith.constant 1.000000e+00 : f32
    %67 = vector.broadcast %cst_26 : f32 to vector<4x64xf32>
    %68 = arith.addf %67, %66 : vector<4x64xf32>
    %69 = arith.divf %67, %68 : vector<4x64xf32>
    %70 = arith.mulf %61, %42 : vector<4x64xf32>
    %71 = arith.mulf %55, %63 : vector<4x64xf32>
    %72 = arith.addf %70, %71 : vector<4x64xf32>
    %73 = math.tanh %72 : vector<4x64xf32>
    %74 = arith.mulf %69, %73 : vector<4x64xf32>
    %cst_27 = arith.constant dense<0.000000e+00> : vector<4x256xf32>
    %75 = tpu.matmul %5, %10, %cst_27 {dimension_numbers = #tpu.dot_dimension_numbers<[1], [0], [0], [1], [0, 0, 1, 1], [], []>} : vector<4x128xf32>, vector<128x256xf32>, vector<4x256xf32> -> vector<4x256xf32>
    %cst_28 = arith.constant dense<0.000000e+00> : vector<4x256xf32>
    %76 = tpu.matmul %74, %11, %cst_28 {dimension_numbers = #tpu.dot_dimension_numbers<[1], [0], [0], [1], [0, 0, 1, 1], [], []>} : vector<4x64xf32>, vector<64x256xf32>, vector<4x256xf32> -> vector<4x256xf32>
    %77 = arith.addf %75, %76 : vector<4x256xf32>
    %78 = vector.broadcast %12 : vector<1x256xf32> to vector<4x256xf32>
    %79 = arith.addf %77, %78 : vector<4x256xf32>
    %80 = vector.extract_strided_slice %79 {offsets = [0, 0], sizes = [4, 64], strides = [1, 1]} : vector<4x256xf32> to vector<4x64xf32>
    %81 = arith.negf %80 : vector<4x64xf32>
    %82 = math.exp %81 : vector<4x64xf32>
    %cst_29 = arith.constant 1.000000e+00 : f32
    %83 = vector.broadcast %cst_29 : f32 to vector<4x64xf32>
    %84 = arith.addf %83, %82 : vector<4x64xf32>
    %85 = arith.divf %83, %84 : vector<4x64xf32>
    %86 = vector.extract_strided_slice %79 {offsets = [0, 64], sizes = [4, 64], strides = [1, 1]} : vector<4x256xf32> to vector<4x64xf32>
    %87 = arith.negf %86 : vector<4x64xf32>
    %88 = math.exp %87 : vector<4x64xf32>
    %cst_30 = arith.constant 1.000000e+00 : f32
    %89 = vector.broadcast %cst_30 : f32 to vector<4x64xf32>
    %90 = arith.addf %89, %88 : vector<4x64xf32>
    %91 = arith.divf %89, %90 : vector<4x64xf32>
    %92 = vector.extract_strided_slice %79 {offsets = [0, 128], sizes = [4, 64], strides = [1, 1]} : vector<4x256xf32> to vector<4x64xf32>
    %93 = math.tanh %92 : vector<4x64xf32>
    %94 = vector.extract_strided_slice %79 {offsets = [0, 192], sizes = [4, 64], strides = [1, 1]} : vector<4x256xf32> to vector<4x64xf32>
    %95 = arith.negf %94 : vector<4x64xf32>
    %96 = math.exp %95 : vector<4x64xf32>
    %cst_31 = arith.constant 1.000000e+00 : f32
    %97 = vector.broadcast %cst_31 : f32 to vector<4x64xf32>
    %98 = arith.addf %97, %96 : vector<4x64xf32>
    %99 = arith.divf %97, %98 : vector<4x64xf32>
    %100 = arith.mulf %91, %72 : vector<4x64xf32>
    %101 = arith.mulf %85, %93 : vector<4x64xf32>
    %102 = arith.addf %100, %101 : vector<4x64xf32>
    %103 = math.tanh %102 : vector<4x64xf32>
    %104 = arith.mulf %99, %103 : vector<4x64xf32>
    %cst_32 = arith.constant dense<0.000000e+00> : vector<4x256xf32>
    %105 = tpu.matmul %7, %10, %cst_32 {dimension_numbers = #tpu.dot_dimension_numbers<[1], [0], [0], [1], [0, 0, 1, 1], [], []>} : vector<4x128xf32>, vector<128x256xf32>, vector<4x256xf32> -> vector<4x256xf32>
    %cst_33 = arith.constant dense<0.000000e+00> : vector<4x256xf32>
    %106 = tpu.matmul %104, %11, %cst_33 {dimension_numbers = #tpu.dot_dimension_numbers<[1], [0], [0], [1], [0, 0, 1, 1], [], []>} : vector<4x64xf32>, vector<64x256xf32>, vector<4x256xf32> -> vector<4x256xf32>
    %107 = arith.addf %105, %106 : vector<4x256xf32>
    %108 = vector.broadcast %12 : vector<1x256xf32> to vector<4x256xf32>
    %109 = arith.addf %107, %108 : vector<4x256xf32>
    %110 = vector.extract_strided_slice %109 {offsets = [0, 0], sizes = [4, 64], strides = [1, 1]} : vector<4x256xf32> to vector<4x64xf32>
    %111 = arith.negf %110 : vector<4x64xf32>
    %112 = math.exp %111 : vector<4x64xf32>
    %cst_34 = arith.constant 1.000000e+00 : f32
    %113 = vector.broadcast %cst_34 : f32 to vector<4x64xf32>
    %114 = arith.addf %113, %112 : vector<4x64xf32>
    %115 = arith.divf %113, %114 : vector<4x64xf32>
    %116 = vector.extract_strided_slice %109 {offsets = [0, 64], sizes = [4, 64], strides = [1, 1]} : vector<4x256xf32> to vector<4x64xf32>
    %117 = arith.negf %116 : vector<4x64xf32>
    %118 = math.exp %117 : vector<4x64xf32>
    %cst_35 = arith.constant 1.000000e+00 : f32
    %119 = vector.broadcast %cst_35 : f32 to vector<4x64xf32>
    %120 = arith.addf %119, %118 : vector<4x64xf32>
    %121 = arith.divf %119, %120 : vector<4x64xf32>
    %122 = vector.extract_strided_slice %109 {offsets = [0, 128], sizes = [4, 64], strides = [1, 1]} : vector<4x256xf32> to vector<4x64xf32>
    %123 = math.tanh %122 : vector<4x64xf32>
    %124 = vector.extract_strided_slice %109 {offsets = [0, 192], sizes = [4, 64], strides = [1, 1]} : vector<4x256xf32> to vector<4x64xf32>
    %125 = arith.negf %124 : vector<4x64xf32>
    %126 = math.exp %125 : vector<4x64xf32>
    %cst_36 = arith.constant 1.000000e+00 : f32
    %127 = vector.broadcast %cst_36 : f32 to vector<4x64xf32>
    %128 = arith.addf %127, %126 : vector<4x64xf32>
    %129 = arith.divf %127, %128 : vector<4x64xf32>
    %130 = arith.mulf %121, %102 : vector<4x64xf32>
    %131 = arith.mulf %115, %123 : vector<4x64xf32>
    %132 = arith.addf %130, %131 : vector<4x64xf32>
    %133 = math.tanh %132 : vector<4x64xf32>
    %134 = arith.mulf %129, %133 : vector<4x64xf32>
    %cst_37 = arith.constant dense<0.000000e+00> : vector<4x256xf32>
    %135 = tpu.matmul %9, %10, %cst_37 {dimension_numbers = #tpu.dot_dimension_numbers<[1], [0], [0], [1], [0, 0, 1, 1], [], []>} : vector<4x128xf32>, vector<128x256xf32>, vector<4x256xf32> -> vector<4x256xf32>
    %cst_38 = arith.constant dense<0.000000e+00> : vector<4x256xf32>
    %136 = tpu.matmul %134, %11, %cst_38 {dimension_numbers = #tpu.dot_dimension_numbers<[1], [0], [0], [1], [0, 0, 1, 1], [], []>} : vector<4x64xf32>, vector<64x256xf32>, vector<4x256xf32> -> vector<4x256xf32>
    %137 = arith.addf %135, %136 : vector<4x256xf32>
    %138 = vector.broadcast %12 : vector<1x256xf32> to vector<4x256xf32>
    %139 = arith.addf %137, %138 : vector<4x256xf32>
    %140 = vector.extract_strided_slice %139 {offsets = [0, 0], sizes = [4, 64], strides = [1, 1]} : vector<4x256xf32> to vector<4x64xf32>
    %141 = arith.negf %140 : vector<4x64xf32>
    %142 = math.exp %141 : vector<4x64xf32>
    %cst_39 = arith.constant 1.000000e+00 : f32
    %143 = vector.broadcast %cst_39 : f32 to vector<4x64xf32>
    %144 = arith.addf %143, %142 : vector<4x64xf32>
    %145 = arith.divf %143, %144 : vector<4x64xf32>
    %146 = vector.extract_strided_slice %139 {offsets = [0, 64], sizes = [4, 64], strides = [1, 1]} : vector<4x256xf32> to vector<4x64xf32>
    %147 = arith.negf %146 : vector<4x64xf32>
    %148 = math.exp %147 : vector<4x64xf32>
    %cst_40 = arith.constant 1.000000e+00 : f32
    %149 = vector.broadcast %cst_40 : f32 to vector<4x64xf32>
    %150 = arith.addf %149, %148 : vector<4x64xf32>
    %151 = arith.divf %149, %150 : vector<4x64xf32>
    %152 = vector.extract_strided_slice %139 {offsets = [0, 128], sizes = [4, 64], strides = [1, 1]} : vector<4x256xf32> to vector<4x64xf32>
    %153 = math.tanh %152 : vector<4x64xf32>
    %154 = vector.extract_strided_slice %139 {offsets = [0, 192], sizes = [4, 64], strides = [1, 1]} : vector<4x256xf32> to vector<4x64xf32>
    %155 = arith.negf %154 : vector<4x64xf32>
    %156 = math.exp %155 : vector<4x64xf32>
    %cst_41 = arith.constant 1.000000e+00 : f32
    %157 = vector.broadcast %cst_41 : f32 to vector<4x64xf32>
    %158 = arith.addf %157, %156 : vector<4x64xf32>
    %159 = arith.divf %157, %158 : vector<4x64xf32>
    %160 = arith.mulf %151, %132 : vector<4x64xf32>
    %161 = arith.mulf %145, %153 : vector<4x64xf32>
    %162 = arith.addf %160, %161 : vector<4x64xf32>
    %163 = math.tanh %162 : vector<4x64xf32>
    %164 = arith.mulf %159, %163 : vector<4x64xf32>
    %c0_42 = arith.constant 0 : index
    %c0_43 = arith.constant 0 : index
    %165 = vector.load %arg4[%c0_42, %c0_43] : memref<64x256xf32, #tpu.memory_space<vmem>>, vector<64x256xf32>
    %c0_44 = arith.constant 0 : index
    %c0_45 = arith.constant 0 : index
    %166 = vector.load %arg5[%c0_44, %c0_45] : memref<64x256xf32, #tpu.memory_space<vmem>>, vector<64x256xf32>
    %c0_46 = arith.constant 0 : index
    %c0_47 = arith.constant 0 : index
    %167 = vector.load %arg6[%c0_46, %c0_47] : memref<1x256xf32, #tpu.memory_space<vmem>>, vector<1x256xf32>
    %cst_48 = arith.constant 0.000000e+00 : f32
    %168 = vector.broadcast %cst_48 : f32 to vector<4x64xf32>
    %cst_49 = arith.constant 0.000000e+00 : f32
    %169 = vector.broadcast %cst_49 : f32 to vector<4x64xf32>
    %cst_50 = arith.constant dense<0.000000e+00> : vector<4x256xf32>
    %170 = tpu.matmul %44, %165, %cst_50 {dimension_numbers = #tpu.dot_dimension_numbers<[1], [0], [0], [1], [0, 0, 1, 1], [], []>} : vector<4x64xf32>, vector<64x256xf32>, vector<4x256xf32> -> vector<4x256xf32>
    %cst_51 = arith.constant dense<0.000000e+00> : vector<4x256xf32>
    %171 = tpu.matmul %168, %166, %cst_51 {dimension_numbers = #tpu.dot_dimension_numbers<[1], [0], [0], [1], [0, 0, 1, 1], [], []>} : vector<4x64xf32>, vector<64x256xf32>, vector<4x256xf32> -> vector<4x256xf32>
    %172 = arith.addf %170, %171 : vector<4x256xf32>
    %173 = vector.broadcast %167 : vector<1x256xf32> to vector<4x256xf32>
    %174 = arith.addf %172, %173 : vector<4x256xf32>
    %175 = vector.extract_strided_slice %174 {offsets = [0, 0], sizes = [4, 64], strides = [1, 1]} : vector<4x256xf32> to vector<4x64xf32>
    %176 = arith.negf %175 : vector<4x64xf32>
    %177 = math.exp %176 : vector<4x64xf32>
    %cst_52 = arith.constant 1.000000e+00 : f32
    %178 = vector.broadcast %cst_52 : f32 to vector<4x64xf32>
    %179 = arith.addf %178, %177 : vector<4x64xf32>
    %180 = arith.divf %178, %179 : vector<4x64xf32>
    %181 = vector.extract_strided_slice %174 {offsets = [0, 64], sizes = [4, 64], strides = [1, 1]} : vector<4x256xf32> to vector<4x64xf32>
    %182 = arith.negf %181 : vector<4x64xf32>
    %183 = math.exp %182 : vector<4x64xf32>
    %cst_53 = arith.constant 1.000000e+00 : f32
    %184 = vector.broadcast %cst_53 : f32 to vector<4x64xf32>
    %185 = arith.addf %184, %183 : vector<4x64xf32>
    %186 = arith.divf %184, %185 : vector<4x64xf32>
    %187 = vector.extract_strided_slice %174 {offsets = [0, 128], sizes = [4, 64], strides = [1, 1]} : vector<4x256xf32> to vector<4x64xf32>
    %188 = math.tanh %187 : vector<4x64xf32>
    %189 = vector.extract_strided_slice %174 {offsets = [0, 192], sizes = [4, 64], strides = [1, 1]} : vector<4x256xf32> to vector<4x64xf32>
    %190 = arith.negf %189 : vector<4x64xf32>
    %191 = math.exp %190 : vector<4x64xf32>
    %cst_54 = arith.constant 1.000000e+00 : f32
    %192 = vector.broadcast %cst_54 : f32 to vector<4x64xf32>
    %193 = arith.addf %192, %191 : vector<4x64xf32>
    %194 = arith.divf %192, %193 : vector<4x64xf32>
    %195 = arith.mulf %186, %169 : vector<4x64xf32>
    %196 = arith.mulf %180, %188 : vector<4x64xf32>
    %197 = arith.addf %195, %196 : vector<4x64xf32>
    %198 = math.tanh %197 : vector<4x64xf32>
    %199 = arith.mulf %194, %198 : vector<4x64xf32>
    %cst_55 = arith.constant dense<0.000000e+00> : vector<4x256xf32>
    %200 = tpu.matmul %74, %165, %cst_55 {dimension_numbers = #tpu.dot_dimension_numbers<[1], [0], [0], [1], [0, 0, 1, 1], [], []>} : vector<4x64xf32>, vector<64x256xf32>, vector<4x256xf32> -> vector<4x256xf32>
    %cst_56 = arith.constant dense<0.000000e+00> : vector<4x256xf32>
    %201 = tpu.matmul %199, %166, %cst_56 {dimension_numbers = #tpu.dot_dimension_numbers<[1], [0], [0], [1], [0, 0, 1, 1], [], []>} : vector<4x64xf32>, vector<64x256xf32>, vector<4x256xf32> -> vector<4x256xf32>
    %202 = arith.addf %200, %201 : vector<4x256xf32>
    %203 = vector.broadcast %167 : vector<1x256xf32> to vector<4x256xf32>
    %204 = arith.addf %202, %203 : vector<4x256xf32>
    %205 = vector.extract_strided_slice %204 {offsets = [0, 0], sizes = [4, 64], strides = [1, 1]} : vector<4x256xf32> to vector<4x64xf32>
    %206 = arith.negf %205 : vector<4x64xf32>
    %207 = math.exp %206 : vector<4x64xf32>
    %cst_57 = arith.constant 1.000000e+00 : f32
    %208 = vector.broadcast %cst_57 : f32 to vector<4x64xf32>
    %209 = arith.addf %208, %207 : vector<4x64xf32>
    %210 = arith.divf %208, %209 : vector<4x64xf32>
    %211 = vector.extract_strided_slice %204 {offsets = [0, 64], sizes = [4, 64], strides = [1, 1]} : vector<4x256xf32> to vector<4x64xf32>
    %212 = arith.negf %211 : vector<4x64xf32>
    %213 = math.exp %212 : vector<4x64xf32>
    %cst_58 = arith.constant 1.000000e+00 : f32
    %214 = vector.broadcast %cst_58 : f32 to vector<4x64xf32>
    %215 = arith.addf %214, %213 : vector<4x64xf32>
    %216 = arith.divf %214, %215 : vector<4x64xf32>
    %217 = vector.extract_strided_slice %204 {offsets = [0, 128], sizes = [4, 64], strides = [1, 1]} : vector<4x256xf32> to vector<4x64xf32>
    %218 = math.tanh %217 : vector<4x64xf32>
    %219 = vector.extract_strided_slice %204 {offsets = [0, 192], sizes = [4, 64], strides = [1, 1]} : vector<4x256xf32> to vector<4x64xf32>
    %220 = arith.negf %219 : vector<4x64xf32>
    %221 = math.exp %220 : vector<4x64xf32>
    %cst_59 = arith.constant 1.000000e+00 : f32
    %222 = vector.broadcast %cst_59 : f32 to vector<4x64xf32>
    %223 = arith.addf %222, %221 : vector<4x64xf32>
    %224 = arith.divf %222, %223 : vector<4x64xf32>
    %225 = arith.mulf %216, %197 : vector<4x64xf32>
    %226 = arith.mulf %210, %218 : vector<4x64xf32>
    %227 = arith.addf %225, %226 : vector<4x64xf32>
    %228 = math.tanh %227 : vector<4x64xf32>
    %229 = arith.mulf %224, %228 : vector<4x64xf32>
    %cst_60 = arith.constant dense<0.000000e+00> : vector<4x256xf32>
    %230 = tpu.matmul %104, %165, %cst_60 {dimension_numbers = #tpu.dot_dimension_numbers<[1], [0], [0], [1], [0, 0, 1, 1], [], []>} : vector<4x64xf32>, vector<64x256xf32>, vector<4x256xf32> -> vector<4x256xf32>
    %cst_61 = arith.constant dense<0.000000e+00> : vector<4x256xf32>
    %231 = tpu.matmul %229, %166, %cst_61 {dimension_numbers = #tpu.dot_dimension_numbers<[1], [0], [0], [1], [0, 0, 1, 1], [], []>} : vector<4x64xf32>, vector<64x256xf32>, vector<4x256xf32> -> vector<4x256xf32>
    %232 = arith.addf %230, %231 : vector<4x256xf32>
    %233 = vector.broadcast %167 : vector<1x256xf32> to vector<4x256xf32>
    %234 = arith.addf %232, %233 : vector<4x256xf32>
    %235 = vector.extract_strided_slice %234 {offsets = [0, 0], sizes = [4, 64], strides = [1, 1]} : vector<4x256xf32> to vector<4x64xf32>
    %236 = arith.negf %235 : vector<4x64xf32>
    %237 = math.exp %236 : vector<4x64xf32>
    %cst_62 = arith.constant 1.000000e+00 : f32
    %238 = vector.broadcast %cst_62 : f32 to vector<4x64xf32>
    %239 = arith.addf %238, %237 : vector<4x64xf32>
    %240 = arith.divf %238, %239 : vector<4x64xf32>
    %241 = vector.extract_strided_slice %234 {offsets = [0, 64], sizes = [4, 64], strides = [1, 1]} : vector<4x256xf32> to vector<4x64xf32>
    %242 = arith.negf %241 : vector<4x64xf32>
    %243 = math.exp %242 : vector<4x64xf32>
    %cst_63 = arith.constant 1.000000e+00 : f32
    %244 = vector.broadcast %cst_63 : f32 to vector<4x64xf32>
    %245 = arith.addf %244, %243 : vector<4x64xf32>
    %246 = arith.divf %244, %245 : vector<4x64xf32>
    %247 = vector.extract_strided_slice %234 {offsets = [0, 128], sizes = [4, 64], strides = [1, 1]} : vector<4x256xf32> to vector<4x64xf32>
    %248 = math.tanh %247 : vector<4x64xf32>
    %249 = vector.extract_strided_slice %234 {offsets = [0, 192], sizes = [4, 64], strides = [1, 1]} : vector<4x256xf32> to vector<4x64xf32>
    %250 = arith.negf %249 : vector<4x64xf32>
    %251 = math.exp %250 : vector<4x64xf32>
    %cst_64 = arith.constant 1.000000e+00 : f32
    %252 = vector.broadcast %cst_64 : f32 to vector<4x64xf32>
    %253 = arith.addf %252, %251 : vector<4x64xf32>
    %254 = arith.divf %252, %253 : vector<4x64xf32>
    %255 = arith.mulf %246, %227 : vector<4x64xf32>
    %256 = arith.mulf %240, %248 : vector<4x64xf32>
    %257 = arith.addf %255, %256 : vector<4x64xf32>
    %258 = math.tanh %257 : vector<4x64xf32>
    %259 = arith.mulf %254, %258 : vector<4x64xf32>
    %cst_65 = arith.constant dense<0.000000e+00> : vector<4x256xf32>
    %260 = tpu.matmul %134, %165, %cst_65 {dimension_numbers = #tpu.dot_dimension_numbers<[1], [0], [0], [1], [0, 0, 1, 1], [], []>} : vector<4x64xf32>, vector<64x256xf32>, vector<4x256xf32> -> vector<4x256xf32>
    %cst_66 = arith.constant dense<0.000000e+00> : vector<4x256xf32>
    %261 = tpu.matmul %259, %166, %cst_66 {dimension_numbers = #tpu.dot_dimension_numbers<[1], [0], [0], [1], [0, 0, 1, 1], [], []>} : vector<4x64xf32>, vector<64x256xf32>, vector<4x256xf32> -> vector<4x256xf32>
    %262 = arith.addf %260, %261 : vector<4x256xf32>
    %263 = vector.broadcast %167 : vector<1x256xf32> to vector<4x256xf32>
    %264 = arith.addf %262, %263 : vector<4x256xf32>
    %265 = vector.extract_strided_slice %264 {offsets = [0, 0], sizes = [4, 64], strides = [1, 1]} : vector<4x256xf32> to vector<4x64xf32>
    %266 = arith.negf %265 : vector<4x64xf32>
    %267 = math.exp %266 : vector<4x64xf32>
    %cst_67 = arith.constant 1.000000e+00 : f32
    %268 = vector.broadcast %cst_67 : f32 to vector<4x64xf32>
    %269 = arith.addf %268, %267 : vector<4x64xf32>
    %270 = arith.divf %268, %269 : vector<4x64xf32>
    %271 = vector.extract_strided_slice %264 {offsets = [0, 64], sizes = [4, 64], strides = [1, 1]} : vector<4x256xf32> to vector<4x64xf32>
    %272 = arith.negf %271 : vector<4x64xf32>
    %273 = math.exp %272 : vector<4x64xf32>
    %cst_68 = arith.constant 1.000000e+00 : f32
    %274 = vector.broadcast %cst_68 : f32 to vector<4x64xf32>
    %275 = arith.addf %274, %273 : vector<4x64xf32>
    %276 = arith.divf %274, %275 : vector<4x64xf32>
    %277 = vector.extract_strided_slice %264 {offsets = [0, 128], sizes = [4, 64], strides = [1, 1]} : vector<4x256xf32> to vector<4x64xf32>
    %278 = math.tanh %277 : vector<4x64xf32>
    %279 = vector.extract_strided_slice %264 {offsets = [0, 192], sizes = [4, 64], strides = [1, 1]} : vector<4x256xf32> to vector<4x64xf32>
    %280 = arith.negf %279 : vector<4x64xf32>
    %281 = math.exp %280 : vector<4x64xf32>
    %cst_69 = arith.constant 1.000000e+00 : f32
    %282 = vector.broadcast %cst_69 : f32 to vector<4x64xf32>
    %283 = arith.addf %282, %281 : vector<4x64xf32>
    %284 = arith.divf %282, %283 : vector<4x64xf32>
    %285 = arith.mulf %276, %257 : vector<4x64xf32>
    %286 = arith.mulf %270, %278 : vector<4x64xf32>
    %287 = arith.addf %285, %286 : vector<4x64xf32>
    %288 = math.tanh %287 : vector<4x64xf32>
    %289 = arith.mulf %284, %288 : vector<4x64xf32>
    %cst_70 = arith.constant dense<0.000000e+00> : vector<4x256xf32>
    %290 = tpu.matmul %164, %165, %cst_70 {dimension_numbers = #tpu.dot_dimension_numbers<[1], [0], [0], [1], [0, 0, 1, 1], [], []>} : vector<4x64xf32>, vector<64x256xf32>, vector<4x256xf32> -> vector<4x256xf32>
    %cst_71 = arith.constant dense<0.000000e+00> : vector<4x256xf32>
    %291 = tpu.matmul %289, %166, %cst_71 {dimension_numbers = #tpu.dot_dimension_numbers<[1], [0], [0], [1], [0, 0, 1, 1], [], []>} : vector<4x64xf32>, vector<64x256xf32>, vector<4x256xf32> -> vector<4x256xf32>
    %292 = arith.addf %290, %291 : vector<4x256xf32>
    %293 = vector.broadcast %167 : vector<1x256xf32> to vector<4x256xf32>
    %294 = arith.addf %292, %293 : vector<4x256xf32>
    %295 = vector.extract_strided_slice %294 {offsets = [0, 0], sizes = [4, 64], strides = [1, 1]} : vector<4x256xf32> to vector<4x64xf32>
    %296 = arith.negf %295 : vector<4x64xf32>
    %297 = math.exp %296 : vector<4x64xf32>
    %cst_72 = arith.constant 1.000000e+00 : f32
    %298 = vector.broadcast %cst_72 : f32 to vector<4x64xf32>
    %299 = arith.addf %298, %297 : vector<4x64xf32>
    %300 = arith.divf %298, %299 : vector<4x64xf32>
    %301 = vector.extract_strided_slice %294 {offsets = [0, 64], sizes = [4, 64], strides = [1, 1]} : vector<4x256xf32> to vector<4x64xf32>
    %302 = arith.negf %301 : vector<4x64xf32>
    %303 = math.exp %302 : vector<4x64xf32>
    %cst_73 = arith.constant 1.000000e+00 : f32
    %304 = vector.broadcast %cst_73 : f32 to vector<4x64xf32>
    %305 = arith.addf %304, %303 : vector<4x64xf32>
    %306 = arith.divf %304, %305 : vector<4x64xf32>
    %307 = vector.extract_strided_slice %294 {offsets = [0, 128], sizes = [4, 64], strides = [1, 1]} : vector<4x256xf32> to vector<4x64xf32>
    %308 = math.tanh %307 : vector<4x64xf32>
    %309 = vector.extract_strided_slice %294 {offsets = [0, 192], sizes = [4, 64], strides = [1, 1]} : vector<4x256xf32> to vector<4x64xf32>
    %310 = arith.negf %309 : vector<4x64xf32>
    %311 = math.exp %310 : vector<4x64xf32>
    %cst_74 = arith.constant 1.000000e+00 : f32
    %312 = vector.broadcast %cst_74 : f32 to vector<4x64xf32>
    %313 = arith.addf %312, %311 : vector<4x64xf32>
    %314 = arith.divf %312, %313 : vector<4x64xf32>
    %315 = arith.mulf %306, %287 : vector<4x64xf32>
    %316 = arith.mulf %300, %308 : vector<4x64xf32>
    %317 = arith.addf %315, %316 : vector<4x64xf32>
    %318 = math.tanh %317 : vector<4x64xf32>
    %319 = arith.mulf %314, %318 : vector<4x64xf32>
    %c0_75 = arith.constant 0 : index
    %c0_76 = arith.constant 0 : index
    %320 = vector.load %arg7[%c0_75, %c0_76] : memref<64x256xf32, #tpu.memory_space<vmem>>, vector<64x256xf32>
    %c0_77 = arith.constant 0 : index
    %c0_78 = arith.constant 0 : index
    %321 = vector.load %arg8[%c0_77, %c0_78] : memref<64x256xf32, #tpu.memory_space<vmem>>, vector<64x256xf32>
    %c0_79 = arith.constant 0 : index
    %c0_80 = arith.constant 0 : index
    %322 = vector.load %arg9[%c0_79, %c0_80] : memref<1x256xf32, #tpu.memory_space<vmem>>, vector<1x256xf32>
    %cst_81 = arith.constant 0.000000e+00 : f32
    %323 = vector.broadcast %cst_81 : f32 to vector<4x64xf32>
    %cst_82 = arith.constant 0.000000e+00 : f32
    %324 = vector.broadcast %cst_82 : f32 to vector<4x64xf32>
    %cst_83 = arith.constant dense<0.000000e+00> : vector<4x256xf32>
    %325 = tpu.matmul %199, %320, %cst_83 {dimension_numbers = #tpu.dot_dimension_numbers<[1], [0], [0], [1], [0, 0, 1, 1], [], []>} : vector<4x64xf32>, vector<64x256xf32>, vector<4x256xf32> -> vector<4x256xf32>
    %cst_84 = arith.constant dense<0.000000e+00> : vector<4x256xf32>
    %326 = tpu.matmul %323, %321, %cst_84 {dimension_numbers = #tpu.dot_dimension_numbers<[1], [0], [0], [1], [0, 0, 1, 1], [], []>} : vector<4x64xf32>, vector<64x256xf32>, vector<4x256xf32> -> vector<4x256xf32>
    %327 = arith.addf %325, %326 : vector<4x256xf32>
    %328 = vector.broadcast %322 : vector<1x256xf32> to vector<4x256xf32>
    %329 = arith.addf %327, %328 : vector<4x256xf32>
    %330 = vector.extract_strided_slice %329 {offsets = [0, 0], sizes = [4, 64], strides = [1, 1]} : vector<4x256xf32> to vector<4x64xf32>
    %331 = arith.negf %330 : vector<4x64xf32>
    %332 = math.exp %331 : vector<4x64xf32>
    %cst_85 = arith.constant 1.000000e+00 : f32
    %333 = vector.broadcast %cst_85 : f32 to vector<4x64xf32>
    %334 = arith.addf %333, %332 : vector<4x64xf32>
    %335 = arith.divf %333, %334 : vector<4x64xf32>
    %336 = vector.extract_strided_slice %329 {offsets = [0, 64], sizes = [4, 64], strides = [1, 1]} : vector<4x256xf32> to vector<4x64xf32>
    %337 = arith.negf %336 : vector<4x64xf32>
    %338 = math.exp %337 : vector<4x64xf32>
    %cst_86 = arith.constant 1.000000e+00 : f32
    %339 = vector.broadcast %cst_86 : f32 to vector<4x64xf32>
    %340 = arith.addf %339, %338 : vector<4x64xf32>
    %341 = arith.divf %339, %340 : vector<4x64xf32>
    %342 = vector.extract_strided_slice %329 {offsets = [0, 128], sizes = [4, 64], strides = [1, 1]} : vector<4x256xf32> to vector<4x64xf32>
    %343 = math.tanh %342 : vector<4x64xf32>
    %344 = vector.extract_strided_slice %329 {offsets = [0, 192], sizes = [4, 64], strides = [1, 1]} : vector<4x256xf32> to vector<4x64xf32>
    %345 = arith.negf %344 : vector<4x64xf32>
    %346 = math.exp %345 : vector<4x64xf32>
    %cst_87 = arith.constant 1.000000e+00 : f32
    %347 = vector.broadcast %cst_87 : f32 to vector<4x64xf32>
    %348 = arith.addf %347, %346 : vector<4x64xf32>
    %349 = arith.divf %347, %348 : vector<4x64xf32>
    %350 = arith.mulf %341, %324 : vector<4x64xf32>
    %351 = arith.mulf %335, %343 : vector<4x64xf32>
    %352 = arith.addf %350, %351 : vector<4x64xf32>
    %353 = math.tanh %352 : vector<4x64xf32>
    %354 = arith.mulf %349, %353 : vector<4x64xf32>
    %cst_88 = arith.constant dense<0.000000e+00> : vector<4x256xf32>
    %355 = tpu.matmul %229, %320, %cst_88 {dimension_numbers = #tpu.dot_dimension_numbers<[1], [0], [0], [1], [0, 0, 1, 1], [], []>} : vector<4x64xf32>, vector<64x256xf32>, vector<4x256xf32> -> vector<4x256xf32>
    %cst_89 = arith.constant dense<0.000000e+00> : vector<4x256xf32>
    %356 = tpu.matmul %354, %321, %cst_89 {dimension_numbers = #tpu.dot_dimension_numbers<[1], [0], [0], [1], [0, 0, 1, 1], [], []>} : vector<4x64xf32>, vector<64x256xf32>, vector<4x256xf32> -> vector<4x256xf32>
    %357 = arith.addf %355, %356 : vector<4x256xf32>
    %358 = vector.broadcast %322 : vector<1x256xf32> to vector<4x256xf32>
    %359 = arith.addf %357, %358 : vector<4x256xf32>
    %360 = vector.extract_strided_slice %359 {offsets = [0, 0], sizes = [4, 64], strides = [1, 1]} : vector<4x256xf32> to vector<4x64xf32>
    %361 = arith.negf %360 : vector<4x64xf32>
    %362 = math.exp %361 : vector<4x64xf32>
    %cst_90 = arith.constant 1.000000e+00 : f32
    %363 = vector.broadcast %cst_90 : f32 to vector<4x64xf32>
    %364 = arith.addf %363, %362 : vector<4x64xf32>
    %365 = arith.divf %363, %364 : vector<4x64xf32>
    %366 = vector.extract_strided_slice %359 {offsets = [0, 64], sizes = [4, 64], strides = [1, 1]} : vector<4x256xf32> to vector<4x64xf32>
    %367 = arith.negf %366 : vector<4x64xf32>
    %368 = math.exp %367 : vector<4x64xf32>
    %cst_91 = arith.constant 1.000000e+00 : f32
    %369 = vector.broadcast %cst_91 : f32 to vector<4x64xf32>
    %370 = arith.addf %369, %368 : vector<4x64xf32>
    %371 = arith.divf %369, %370 : vector<4x64xf32>
    %372 = vector.extract_strided_slice %359 {offsets = [0, 128], sizes = [4, 64], strides = [1, 1]} : vector<4x256xf32> to vector<4x64xf32>
    %373 = math.tanh %372 : vector<4x64xf32>
    %374 = vector.extract_strided_slice %359 {offsets = [0, 192], sizes = [4, 64], strides = [1, 1]} : vector<4x256xf32> to vector<4x64xf32>
    %375 = arith.negf %374 : vector<4x64xf32>
    %376 = math.exp %375 : vector<4x64xf32>
    %cst_92 = arith.constant 1.000000e+00 : f32
    %377 = vector.broadcast %cst_92 : f32 to vector<4x64xf32>
    %378 = arith.addf %377, %376 : vector<4x64xf32>
    %379 = arith.divf %377, %378 : vector<4x64xf32>
    %380 = arith.mulf %371, %352 : vector<4x64xf32>
    %381 = arith.mulf %365, %373 : vector<4x64xf32>
    %382 = arith.addf %380, %381 : vector<4x64xf32>
    %383 = math.tanh %382 : vector<4x64xf32>
    %384 = arith.mulf %379, %383 : vector<4x64xf32>
    %cst_93 = arith.constant dense<0.000000e+00> : vector<4x256xf32>
    %385 = tpu.matmul %259, %320, %cst_93 {dimension_numbers = #tpu.dot_dimension_numbers<[1], [0], [0], [1], [0, 0, 1, 1], [], []>} : vector<4x64xf32>, vector<64x256xf32>, vector<4x256xf32> -> vector<4x256xf32>
    %cst_94 = arith.constant dense<0.000000e+00> : vector<4x256xf32>
    %386 = tpu.matmul %384, %321, %cst_94 {dimension_numbers = #tpu.dot_dimension_numbers<[1], [0], [0], [1], [0, 0, 1, 1], [], []>} : vector<4x64xf32>, vector<64x256xf32>, vector<4x256xf32> -> vector<4x256xf32>
    %387 = arith.addf %385, %386 : vector<4x256xf32>
    %388 = vector.broadcast %322 : vector<1x256xf32> to vector<4x256xf32>
    %389 = arith.addf %387, %388 : vector<4x256xf32>
    %390 = vector.extract_strided_slice %389 {offsets = [0, 0], sizes = [4, 64], strides = [1, 1]} : vector<4x256xf32> to vector<4x64xf32>
    %391 = arith.negf %390 : vector<4x64xf32>
    %392 = math.exp %391 : vector<4x64xf32>
    %cst_95 = arith.constant 1.000000e+00 : f32
    %393 = vector.broadcast %cst_95 : f32 to vector<4x64xf32>
    %394 = arith.addf %393, %392 : vector<4x64xf32>
    %395 = arith.divf %393, %394 : vector<4x64xf32>
    %396 = vector.extract_strided_slice %389 {offsets = [0, 64], sizes = [4, 64], strides = [1, 1]} : vector<4x256xf32> to vector<4x64xf32>
    %397 = arith.negf %396 : vector<4x64xf32>
    %398 = math.exp %397 : vector<4x64xf32>
    %cst_96 = arith.constant 1.000000e+00 : f32
    %399 = vector.broadcast %cst_96 : f32 to vector<4x64xf32>
    %400 = arith.addf %399, %398 : vector<4x64xf32>
    %401 = arith.divf %399, %400 : vector<4x64xf32>
    %402 = vector.extract_strided_slice %389 {offsets = [0, 128], sizes = [4, 64], strides = [1, 1]} : vector<4x256xf32> to vector<4x64xf32>
    %403 = math.tanh %402 : vector<4x64xf32>
    %404 = vector.extract_strided_slice %389 {offsets = [0, 192], sizes = [4, 64], strides = [1, 1]} : vector<4x256xf32> to vector<4x64xf32>
    %405 = arith.negf %404 : vector<4x64xf32>
    %406 = math.exp %405 : vector<4x64xf32>
    %cst_97 = arith.constant 1.000000e+00 : f32
    %407 = vector.broadcast %cst_97 : f32 to vector<4x64xf32>
    %408 = arith.addf %407, %406 : vector<4x64xf32>
    %409 = arith.divf %407, %408 : vector<4x64xf32>
    %410 = arith.mulf %401, %382 : vector<4x64xf32>
    %411 = arith.mulf %395, %403 : vector<4x64xf32>
    %412 = arith.addf %410, %411 : vector<4x64xf32>
    %413 = math.tanh %412 : vector<4x64xf32>
    %414 = arith.mulf %409, %413 : vector<4x64xf32>
    %cst_98 = arith.constant dense<0.000000e+00> : vector<4x256xf32>
    %415 = tpu.matmul %289, %320, %cst_98 {dimension_numbers = #tpu.dot_dimension_numbers<[1], [0], [0], [1], [0, 0, 1, 1], [], []>} : vector<4x64xf32>, vector<64x256xf32>, vector<4x256xf32> -> vector<4x256xf32>
    %cst_99 = arith.constant dense<0.000000e+00> : vector<4x256xf32>
    %416 = tpu.matmul %414, %321, %cst_99 {dimension_numbers = #tpu.dot_dimension_numbers<[1], [0], [0], [1], [0, 0, 1, 1], [], []>} : vector<4x64xf32>, vector<64x256xf32>, vector<4x256xf32> -> vector<4x256xf32>
    %417 = arith.addf %415, %416 : vector<4x256xf32>
    %418 = vector.broadcast %322 : vector<1x256xf32> to vector<4x256xf32>
    %419 = arith.addf %417, %418 : vector<4x256xf32>
    %420 = vector.extract_strided_slice %419 {offsets = [0, 0], sizes = [4, 64], strides = [1, 1]} : vector<4x256xf32> to vector<4x64xf32>
    %421 = arith.negf %420 : vector<4x64xf32>
    %422 = math.exp %421 : vector<4x64xf32>
    %cst_100 = arith.constant 1.000000e+00 : f32
    %423 = vector.broadcast %cst_100 : f32 to vector<4x64xf32>
    %424 = arith.addf %423, %422 : vector<4x64xf32>
    %425 = arith.divf %423, %424 : vector<4x64xf32>
    %426 = vector.extract_strided_slice %419 {offsets = [0, 64], sizes = [4, 64], strides = [1, 1]} : vector<4x256xf32> to vector<4x64xf32>
    %427 = arith.negf %426 : vector<4x64xf32>
    %428 = math.exp %427 : vector<4x64xf32>
    %cst_101 = arith.constant 1.000000e+00 : f32
    %429 = vector.broadcast %cst_101 : f32 to vector<4x64xf32>
    %430 = arith.addf %429, %428 : vector<4x64xf32>
    %431 = arith.divf %429, %430 : vector<4x64xf32>
    %432 = vector.extract_strided_slice %419 {offsets = [0, 128], sizes = [4, 64], strides = [1, 1]} : vector<4x256xf32> to vector<4x64xf32>
    %433 = math.tanh %432 : vector<4x64xf32>
    %434 = vector.extract_strided_slice %419 {offsets = [0, 192], sizes = [4, 64], strides = [1, 1]} : vector<4x256xf32> to vector<4x64xf32>
    %435 = arith.negf %434 : vector<4x64xf32>
    %436 = math.exp %435 : vector<4x64xf32>
    %cst_102 = arith.constant 1.000000e+00 : f32
    %437 = vector.broadcast %cst_102 : f32 to vector<4x64xf32>
    %438 = arith.addf %437, %436 : vector<4x64xf32>
    %439 = arith.divf %437, %438 : vector<4x64xf32>
    %440 = arith.mulf %431, %412 : vector<4x64xf32>
    %441 = arith.mulf %425, %433 : vector<4x64xf32>
    %442 = arith.addf %440, %441 : vector<4x64xf32>
    %443 = math.tanh %442 : vector<4x64xf32>
    %444 = arith.mulf %439, %443 : vector<4x64xf32>
    %cst_103 = arith.constant dense<0.000000e+00> : vector<4x256xf32>
    %445 = tpu.matmul %319, %320, %cst_103 {dimension_numbers = #tpu.dot_dimension_numbers<[1], [0], [0], [1], [0, 0, 1, 1], [], []>} : vector<4x64xf32>, vector<64x256xf32>, vector<4x256xf32> -> vector<4x256xf32>
    %cst_104 = arith.constant dense<0.000000e+00> : vector<4x256xf32>
    %446 = tpu.matmul %444, %321, %cst_104 {dimension_numbers = #tpu.dot_dimension_numbers<[1], [0], [0], [1], [0, 0, 1, 1], [], []>} : vector<4x64xf32>, vector<64x256xf32>, vector<4x256xf32> -> vector<4x256xf32>
    %447 = arith.addf %445, %446 : vector<4x256xf32>
    %448 = vector.broadcast %322 : vector<1x256xf32> to vector<4x256xf32>
    %449 = arith.addf %447, %448 : vector<4x256xf32>
    %450 = vector.extract_strided_slice %449 {offsets = [0, 0], sizes = [4, 64], strides = [1, 1]} : vector<4x256xf32> to vector<4x64xf32>
    %451 = arith.negf %450 : vector<4x64xf32>
    %452 = math.exp %451 : vector<4x64xf32>
    %cst_105 = arith.constant 1.000000e+00 : f32
    %453 = vector.broadcast %cst_105 : f32 to vector<4x64xf32>
    %454 = arith.addf %453, %452 : vector<4x64xf32>
    %455 = arith.divf %453, %454 : vector<4x64xf32>
    %456 = vector.extract_strided_slice %449 {offsets = [0, 64], sizes = [4, 64], strides = [1, 1]} : vector<4x256xf32> to vector<4x64xf32>
    %457 = arith.negf %456 : vector<4x64xf32>
    %458 = math.exp %457 : vector<4x64xf32>
    %cst_106 = arith.constant 1.000000e+00 : f32
    %459 = vector.broadcast %cst_106 : f32 to vector<4x64xf32>
    %460 = arith.addf %459, %458 : vector<4x64xf32>
    %461 = arith.divf %459, %460 : vector<4x64xf32>
    %462 = vector.extract_strided_slice %449 {offsets = [0, 128], sizes = [4, 64], strides = [1, 1]} : vector<4x256xf32> to vector<4x64xf32>
    %463 = math.tanh %462 : vector<4x64xf32>
    %464 = vector.extract_strided_slice %449 {offsets = [0, 192], sizes = [4, 64], strides = [1, 1]} : vector<4x256xf32> to vector<4x64xf32>
    %465 = arith.negf %464 : vector<4x64xf32>
    %466 = math.exp %465 : vector<4x64xf32>
    %cst_107 = arith.constant 1.000000e+00 : f32
    %467 = vector.broadcast %cst_107 : f32 to vector<4x64xf32>
    %468 = arith.addf %467, %466 : vector<4x64xf32>
    %469 = arith.divf %467, %468 : vector<4x64xf32>
    %470 = arith.mulf %461, %442 : vector<4x64xf32>
    %471 = arith.mulf %455, %463 : vector<4x64xf32>
    %472 = arith.addf %470, %471 : vector<4x64xf32>
    %473 = math.tanh %472 : vector<4x64xf32>
    %474 = arith.mulf %469, %473 : vector<4x64xf32>
    %c0_108 = arith.constant 0 : index
    %c0_109 = arith.constant 0 : index
    %c0_110 = arith.constant 0 : index
    %475 = vector.load %arg10[%c0_108, %c0_109, %c0_110] : memref<5x4x64xf32, #tpu.memory_space<vmem>>, vector<1x4x64xf32>
    %476 = vector.shape_cast %475 : vector<1x4x64xf32> to vector<4x64xf32>
    %477 = vector.shape_cast %354 : vector<4x64xf32> to vector<1x4x64xf32>
    tpu.vector_store %arg10[%c0_108, %c0_109, %c0_110], %477 {strides = array<i32>} : memref<5x4x64xf32, #tpu.memory_space<vmem>>, vector<1x4x64xf32>,
    %c1_111 = arith.constant 1 : index
    %c0_112 = arith.constant 0 : index
    %c0_113 = arith.constant 0 : index
    %478 = vector.load %arg10[%c1_111, %c0_112, %c0_113] : memref<5x4x64xf32, #tpu.memory_space<vmem>>, vector<1x4x64xf32>
    %479 = vector.shape_cast %478 : vector<1x4x64xf32> to vector<4x64xf32>
    %480 = vector.shape_cast %384 : vector<4x64xf32> to vector<1x4x64xf32>
    tpu.vector_store %arg10[%c1_111, %c0_112, %c0_113], %480 {strides = array<i32>} : memref<5x4x64xf32, #tpu.memory_space<vmem>>, vector<1x4x64xf32>,
    %c2_114 = arith.constant 2 : index
    %c0_115 = arith.constant 0 : index
    %c0_116 = arith.constant 0 : index
    %481 = vector.load %arg10[%c2_114, %c0_115, %c0_116] : memref<5x4x64xf32, #tpu.memory_space<vmem>>, vector<1x4x64xf32>
    %482 = vector.shape_cast %481 : vector<1x4x64xf32> to vector<4x64xf32>
    %483 = vector.shape_cast %414 : vector<4x64xf32> to vector<1x4x64xf32>
    tpu.vector_store %arg10[%c2_114, %c0_115, %c0_116], %483 {strides = array<i32>} : memref<5x4x64xf32, #tpu.memory_space<vmem>>, vector<1x4x64xf32>,
    %c3_117 = arith.constant 3 : index
    %c0_118 = arith.constant 0 : index
    %c0_119 = arith.constant 0 : index
    %484 = vector.load %arg10[%c3_117, %c0_118, %c0_119] : memref<5x4x64xf32, #tpu.memory_space<vmem>>, vector<1x4x64xf32>
    %485 = vector.shape_cast %484 : vector<1x4x64xf32> to vector<4x64xf32>
    %486 = vector.shape_cast %444 : vector<4x64xf32> to vector<1x4x64xf32>
    tpu.vector_store %arg10[%c3_117, %c0_118, %c0_119], %486 {strides = array<i32>} : memref<5x4x64xf32, #tpu.memory_space<vmem>>, vector<1x4x64xf32>,
    %c4_120 = arith.constant 4 : index
    %c0_121 = arith.constant 0 : index
    %c0_122 = arith.constant 0 : index
    %487 = vector.load %arg10[%c4_120, %c0_121, %c0_122] : memref<5x4x64xf32, #tpu.memory_space<vmem>>, vector<1x4x64xf32>
    %488 = vector.shape_cast %487 : vector<1x4x64xf32> to vector<4x64xf32>
    %489 = vector.shape_cast %474 : vector<4x64xf32> to vector<1x4x64xf32>
    tpu.vector_store %arg10[%c4_120, %c0_121, %c0_122], %489 {strides = array<i32>} : memref<5x4x64xf32, #tpu.memory_space<vmem>>, vector<1x4x64xf32>,
    return
  }
}

</mosaic_0001>

<bundles_post_ra>
// kernel: lstm2_forward.1
= control target key start
LH: loop header
LB: loop body
LE: loop exit
PB: predicated region body
PF: predicated region fallthrough
CT: control target
= control target key end

     0   :  { %15 = vsyncpa [#allocation3], 0  ;;  %s4727_s0 = inlined_call_operand.hbm [shape: f32[5,4,128], index: 0, kind: input, shape index: {}]   ;;  %s4728_s1 = inlined_call_operand.hbm [shape: f32[128,256], index: 1, kind: input, shape index: {}]   ;;  %s4729_s2 = inlined_call_operand.hbm [shape: f32[64,256], index: 2, kind: input, shape index: {}]   ;;  %s4730_s3 = inlined_call_operand.vmem [shape: f32[1,256], index: 3, kind: input, shape index: {}]   ;;  %s4731_s4 = inlined_call_operand.hbm [shape: f32[64,256], index: 4, kind: input, shape index: {}]   ;;  %s4732_s5 = inlined_call_operand.hbm [shape: f32[64,256], index: 5, kind: input, shape index: {}]   ;;  %s4733_s6 = inlined_call_operand.vmem [shape: f32[1,256], index: 6, kind: input, shape index: {}]   ;;  %s4734_s7 = inlined_call_operand.hbm [shape: f32[64,256], index: 7, kind: input, shape index: {}]   ;;  %s4735_s8 = inlined_call_operand.hbm [shape: f32[64,256], index: 8, kind: input, shape index: {}]   ;;  %s4736_s9 = inlined_call_operand.vmem [shape: f32[1,256], index: 9, kind: input, shape index: {}]   ;;  %s4737_s10 = inlined_call_operand.hbm [shape: f32[5,4,64], index: 10, kind: output, shape index: {}]  }
   0x1   :  { %16 = vsyncpa [#allocation6], 0 }
   0x2   :  { %17 = vsyncpa [#allocation9], 0 }
   0x3   :  { %18 = vsyncpa [#allocation12], 0 }
   0x4   :  { %19 = vsyncpa [#allocation4], 0  ;;  %s3911_s13 = smov [#allocation5]   ;;  %s3725_s17 = scalar_lea.hbm %s4728_s1, 4096 }
   0x5   :  { %s37_s14 = sshll.u32 %s3911_s13, 4  ;;  %p3726_p0 = scmp.ne.s32.totalorder %s4728_s1, %s3725_s17  ;;  %s38_s14 = int_to_ptr.vmem [resolvable:$true] %s37_s14 }
   0x6   :  { %p3729_p1 = scmp.lt.u32.totalorder %s3725_s17, %s4728_s1 }
   0x8   :  { %p3731_p2 = pnand %p3729_p1, %p3726_p0 }
   0xa   :  { %3734 = shalt.err (!%p3731_p2)
}
   0xb   :  { %s3735_s22 = scalar_lea.vmem %s38_s14, 4096  ;;  %p3740_p4 = scmp.lt.s32.totalorder %s38_s14, %s38_s14 }
   0xc   :  { %p3736_p3 = scmp.ne.s32.totalorder %s38_s14, %s3735_s22  ;;  %p3741_p5 = scmp.lt.s32.totalorder %s3735_s22, %s3735_s22 }
   0xe   :  { %p3742_p6 = por %p3741_p5, %p3740_p4 }
  0x10   :  { %p3743_p7 = pnand %p3742_p6, %p3736_p3 }
  0x12   :  { %3746 = shalt.err (!%p3743_p7)
}
  0x13   :  { %s3912_s23 = smov 256   ;;  %s3913_s24 = smov 16  }
  0x14   :  { %43 = dma.hbm_to_vmem [thread:$0]  %s4728_s1, 4096, %s38_s14, [#allocation6], %s3912_s23, %s3912_s23, %s3913_s24  }
  0x15   :  { %s3914_s27 = smov [#allocation8]   ;;  %s3915_s29 = smov [#allocation11]  }
  0x16   :  { %s63_s28 = sshll.u32 %s3914_s27, 4  ;;  %s89_s30 = sshll.u32 %s3915_s29, 4  ;;  %s64_s28 = int_to_ptr.vmem [resolvable:$true] %s63_s28  ;;  %s90_s30 = int_to_ptr.vmem [resolvable:$true] %s89_s30 }
  0x17   :  { %s3747_s13 = scalar_lea.hbm %s4731_s4, 2048 }
  0x18   :  { %p3748_p8 = scmp.ne.s32.totalorder %s4731_s4, %s3747_s13  ;;  %p3751_p9 = scmp.lt.u32.totalorder %s3747_s13, %s4731_s4 }
  0x1a   :  { %p3753_p10 = pnand %p3751_p9, %p3748_p8 }
  0x1c   :  { %3756 = shalt.err (!%p3753_p10)
}
  0x1d   :  { %s3757_s1 = scalar_lea.vmem %s64_s28, 2048  ;;  %p3762_p12 = scmp.lt.s32.totalorder %s64_s28, %s64_s28 }
  0x1e   :  { %p3758_p11 = scmp.ne.s32.totalorder %s64_s28, %s3757_s1  ;;  %p3763_p13 = scmp.lt.s32.totalorder %s3757_s1, %s3757_s1 }
  0x20   :  { %p3764_p0 = por %p3763_p13, %p3762_p12 }
  0x22   :  { %p3765_p1 = pnand %p3764_p0, %p3758_p11 }
  0x24   :  { %3768 = shalt.err (!%p3765_p1)
}
  0x25   :  { %69 = dma.hbm_to_vmem [thread:$0]  %s4731_s4, 2048, %s64_s28, [#allocation9], %s3912_s23, %s3912_s23, %s3913_s24  }
  0x26   :  { %s3769_s22 = scalar_lea.hbm %s4734_s7, 2048 }
  0x27   :  { %p3770_p2 = scmp.ne.s32.totalorder %s4734_s7, %s3769_s22  ;;  %p3773_p3 = scmp.lt.u32.totalorder %s3769_s22, %s4734_s7 }
  0x29   :  { %p3775_p4 = pnand %p3773_p3, %p3770_p2 }
  0x2b   :  { %3778 = shalt.err (!%p3775_p4)
}
  0x2c   :  { %s3779_s11 = scalar_lea.vmem %s90_s30, 2048  ;;  %p3784_p6 = scmp.lt.s32.totalorder %s90_s30, %s90_s30 }
  0x2d   :  { %p3780_p5 = scmp.ne.s32.totalorder %s90_s30, %s3779_s11  ;;  %p3785_p7 = scmp.lt.s32.totalorder %s3779_s11, %s3779_s11 }
  0x2f   :  { %p3786_p8 = por %p3785_p7, %p3784_p6 }
  0x31   :  { %p3787_p9 = pnand %p3786_p8, %p3780_p5 }
  0x33   :  { %3790 = shalt.err (!%p3787_p9)
}
  0x34   :  { %95 = dma.hbm_to_vmem [thread:$0]  %s4734_s7, 2048, %s90_s30, [#allocation12], %s3912_s23, %s3912_s23, %s3913_s24  }
  0x35   :  { %s3916_s12 = smov [#allocation2]   ;;  %s3791_s17 = scalar_lea.hbm %s4727_s0, 320 }
  0x36   :  { %s25_s13 = sshll.u32 %s3916_s12, 4  ;;  %p3792_p10 = scmp.ne.s32.totalorder %s4727_s0, %s3791_s17  ;;  %s26_s13 = int_to_ptr.vmem [resolvable:$true] %s25_s13 }
  0x37   :  { %p3795_p11 = scmp.lt.u32.totalorder %s3791_s17, %s4727_s0 }
  0x39   :  { %p3797_p12 = pnand %p3795_p11, %p3792_p10 }
  0x3b   :  { %3800 = shalt.err (!%p3797_p12)
}
  0x3c   :  { %s3801_s20 = scalar_lea.vmem %s26_s13, 320  ;;  %p3806_p0 = scmp.lt.s32.totalorder %s26_s13, %s26_s13 }
  0x3d   :  { %p3802_p13 = scmp.ne.s32.totalorder %s26_s13, %s3801_s20  ;;  %p3807_p1 = scmp.lt.s32.totalorder %s3801_s20, %s3801_s20 }
  0x3f   :  { %p3808_p2 = por %p3807_p1, %p3806_p0 }
  0x41   :  { %p3809_p3 = pnand %p3808_p2, %p3802_p13 }
  0x43   :  { %3812 = shalt.err (!%p3809_p3)
}
  0x44   :  { %s3917_s7 = smov 64   ;;  %s3918_s30 = smov 4  }
  0x45   :  { %31 = dma.hbm_to_vmem [thread:$0]  %s4727_s0, 320, %s26_s13, [#allocation3], %s3917_s7, %s3917_s7, %s3918_s30  }
  0x46   :  { %s3919_s25 = smov [#allocation7]   ;;  %s3920_s27 = smov [#allocation10]  }
  0x47   :  { %s49_s26 = sshll.u32 %s3919_s25, 4  ;;  %s75_s29 = sshll.u32 %s3920_s27, 4  ;;  %s50_s26 = int_to_ptr.vmem [resolvable:$true] %s49_s26  ;;  %s4039_s29 = int_to_ptr.vmem [resolvable:$true] %s75_s29 }
  0x48   :  { %s3813_s28 = scalar_lea.hbm %s4729_s2, 2048 }
  0x49   :  { %p3814_p4 = scmp.ne.s32.totalorder %s4729_s2, %s3813_s28  ;;  %p3817_p5 = scmp.lt.u32.totalorder %s3813_s28, %s4729_s2 }
  0x4b   :  { %p3819_p6 = pnand %p3817_p5, %p3814_p4 }
  0x4d   :  { %3822 = shalt.err (!%p3819_p6)
}
  0x4e   :  { %s3823_s0 = scalar_lea.vmem %s50_s26, 2048  ;;  %p3828_p8 = scmp.lt.s32.totalorder %s50_s26, %s50_s26 }
  0x4f   :  { %p3824_p7 = scmp.ne.s32.totalorder %s50_s26, %s3823_s0  ;;  %p3829_p9 = scmp.lt.s32.totalorder %s3823_s0, %s3823_s0 }
  0x51   :  { %p3830_p10 = por %p3829_p9, %p3828_p8 }
  0x53   :  { %p3831_p11 = pnand %p3830_p10, %p3824_p7 }
  0x55   :  { %3834 = shalt.err (!%p3831_p11)
}
  0x56   :  { %55 = dma.hbm_to_vmem [thread:$0]  %s4729_s2, 2048, %s50_s26, [#allocation6], %s3912_s23, %s3912_s23, %s3913_s24  }
  0x57   :  { %s3835_s19 = scalar_lea.hbm %s4732_s5, 2048 }
  0x58   :  { %p3836_p12 = scmp.ne.s32.totalorder %s4732_s5, %s3835_s19  ;;  %p3839_p13 = scmp.lt.u32.totalorder %s3835_s19, %s4732_s5 }
  0x5a   :  { %p3841_p0 = pnand %p3839_p13, %p3836_p12 }
  0x5c   :  { %3844 = shalt.err (!%p3841_p0)
}
  0x5d   :  { %s3845_s27 = scalar_lea.vmem %s4039_s29, 2048  ;;  %p3850_p2 = scmp.lt.s32.totalorder %s4039_s29, %s4039_s29 }
  0x5e   :  { %p3846_p1 = scmp.ne.s32.totalorder %s4039_s29, %s3845_s27  ;;  %p3851_p3 = scmp.lt.s32.totalorder %s3845_s27, %s3845_s27 }
  0x60   :  { %p3852_p4 = por %p3851_p3, %p3850_p2 }
  0x62   :  { %p3853_p5 = pnand %p3852_p4, %p3846_p1 }
  0x64   :  { %3856 = shalt.err (!%p3853_p5)
}
  0x65   :  { %81 = dma.hbm_to_vmem [thread:$0]  %s4732_s5, 2048, %s4039_s29, [#allocation9], %s3912_s23, %s3912_s23, %s3913_s24  }
  0x66   :  { %s3921_s11 = smov [#allocation13]   ;;  %s3857_s15 = scalar_lea.hbm %s4735_s8, 2048 }
  0x67   :  { %s101_s4 = sshll.u32 %s3921_s11, 4  ;;  %p3858_p6 = scmp.ne.s32.totalorder %s4735_s8, %s3857_s15  ;;  %s102_s4 = int_to_ptr.vmem [resolvable:$true] %s101_s4 }
  0x68   :  { %p3861_p7 = scmp.lt.u32.totalorder %s3857_s15, %s4735_s8 }
  0x6a   :  { %p3863_p8 = pnand %p3861_p7, %p3858_p6 }
  0x6c   :  { %3866 = shalt.err (!%p3863_p8)
}
  0x6d   :  { %s3867_s18 = scalar_lea.vmem %s102_s4, 2048  ;;  %p3872_p10 = scmp.lt.s32.totalorder %s102_s4, %s102_s4 }
  0x6e   :  { %p3868_p9 = scmp.ne.s32.totalorder %s102_s4, %s3867_s18  ;;  %p3873_p11 = scmp.lt.s32.totalorder %s3867_s18, %s3867_s18 }
  0x70   :  { %p3874_p12 = por %p3873_p11, %p3872_p10 }
  0x72   :  { %p3875_p13 = pnand %p3874_p12, %p3868_p9 }
  0x74   :  { %3878 = shalt.err (!%p3875_p13)
}
  0x75   :  { %107 = dma.hbm_to_vmem [thread:$0]  %s4735_s8, 2048, %s102_s4, [#allocation12], %s3912_s23, %s3912_s23, %s3913_s24  }
  0x76   :  { %3901 = dma.done.wait [#allocation3], 320  }
  0x77   :  { %3902 = vsyncadd [#allocation3], 4294966976 }
  0x78   :  { %3903 = dma.done.wait [#allocation6], 6144  }
  0x79   :  { %3904 = vsyncadd [#allocation6], 4294961152 }
  0x7a   :  { %3905 = dma.done.wait [#allocation9], 4096  }
  0x7b   :  { %3906 = vsyncadd [#allocation9], 4294963200 }
  0x7c   :  { %3907 = dma.done.wait [#allocation12], 4096  }
  0x7d   :  { %3908 = vsyncadd [#allocation12], 4294963200  ;;  %v3922_v0 = vmov 0.0   ;;  %v173_v1 = vld [vmem:[#allocation7 + $0x8] sm:$0xff]  ;;  %v175_v2 = vld [vmem:[#allocation7 + $0x18] sm:$0xff]  ;;  %vm189_vm0 = vcmask 523264  }
  0x7e   :  { %257 = vmatprep.mubr.f32.mxu0 %v3922_v0  ;;  %439 = vmatprep.mubr.f32.mxu1 %v3922_v0  ;;  %v172_v3 = vld [vmem:[#allocation7] sm:$0xff]  ;;  %v4093_v4 = vpack.c.bf16 %v175_v2, %v173_v1  ;;  %v174_v5 = vld [vmem:[#allocation7 + $0x10] sm:$0xff]  ;;  %v177_v6 = vld [vmem:[#allocation7 + $0x28] sm:$0xff]  ;;  %vm2853_vm1 = vcmask 519168  }
  0x7f   :  { %v179_v7 = vld [vmem:[#allocation7 + $0x38] sm:$0xff]  ;;  %v4095_v8 = vpack.c.bf16 %v174_v5, %v172_v3  ;;  %v176_v10 = vld [vmem:[#allocation7 + $0x20] sm:$0xff]  ;;  %v178_v11 = vld [vmem:[#allocation7 + $0x30] sm:$0xff] }
  0x80   :  { %v4097_v9 = vpack.c.bf16 %v179_v7, %v177_v6  ;;  %v181_v12 = vld [vmem:[#allocation7 + $0x48] sm:$0xff]  ;;  %2943 = vmatprep.subr.bf16.mxu0 %v4093_v4  ;;  %v183_v13 = vld [vmem:[#allocation7 + $0x58] sm:$0xff]  ;;  %2991 = vmatprep.subr.bf16.mxu1 %v4093_v4  ;;  %v4102_v14 = vpack.c.bf16 %v178_v11, %v176_v10  ;;  %v180_v16 = vld [vmem:[#allocation7 + $0x40] sm:$0xff] }
  0x81   :  { %2945 = vmatpush1.bf16.msra.mxu0 %v4095_v8  ;;  %2993 = vmatpush1.bf16.msra.mxu1 %v4095_v8  ;;  %v4106_v15 = vpack.c.bf16 %v183_v13, %v181_v12  ;;  %v182_v17 = vld [vmem:[#allocation7 + $0x50] sm:$0xff]  ;;  %v185_v18 = vld [vmem:[#allocation7 + $0x68] sm:$0xff]  ;;  %v187_v19 = vld [vmem:[#allocation7 + $0x78] sm:$0xff] }
  0x82   :  { %2947 = vmatprep.subr.bf16.mxu0 %v4097_v9  ;;  %2995 = vmatprep.subr.bf16.mxu1 %v4097_v9  ;;  %v4110_v20 = vpack.c.bf16 %v182_v17, %v180_v16  ;;  %v4114_v21 = vpack.c.bf16 %v187_v19, %v185_v18  ;;  %v184_v22 = vld [vmem:[#allocation7 + $0x60] sm:$0xff]  ;;  %v186_v23 = vld [vmem:[#allocation7 + $0x70] sm:$0xff]  ;;  %v141_v24 = vld [vmem:[#allocation5 + $0x8] sm:$0xff]  ;;  %v336_v16 = vlaneseq }
  0x83   :  { %v143_v25 = vld [vmem:[#allocation5 + $0x18] sm:$0xff]  ;;  %v4118_v26 = vpack.c.bf16 %v186_v23, %v184_v22  ;;  %v140_v28 = vld [vmem:[#allocation5] sm:$0xff]  ;;  %v142_v29 = vld [vmem:[#allocation5 + $0x10] sm:$0xff] }
  0x84   :  { %v4122_v27 = vpack.c.bf16 %v143_v25, %v141_v24  ;;  %v145_v30 = vld [vmem:[#allocation5 + $0x28] sm:$0xff]  ;;  %v147_v31 = vld [vmem:[#allocation5 + $0x38] sm:$0xff]  ;;  %v4126_v32 = vpack.c.bf16 %v142_v29, %v140_v28  ;;  %v144_v34 = vld [vmem:[#allocation5 + $0x20] sm:$0xff]  ;;  %v337_v17 = vshrl.u32 %v336_v16, 7 }
  0x85   :  { %2949 = vmatpush1.bf16.msra.mxu0 %v4102_v14  ;;  %2997 = vmatpush1.bf16.msra.mxu1 %v4102_v14  ;;  %v4130_v33 = vpack.c.bf16 %v147_v31, %v145_v30  ;;  %v146_v35 = vld [vmem:[#allocation5 + $0x30] sm:$0xff]  ;;  %v149_v36 = vld [vmem:[#allocation5 + $0x48] sm:$0xff]  ;;  %v151_v37 = vld [vmem:[#allocation5 + $0x58] sm:$0xff] }
  0x86   :  { %2951 = vmatprep.subr.bf16.mxu0 %v4106_v15  ;;  %2999 = vmatprep.subr.bf16.mxu1 %v4106_v15  ;;  %v4135_v38 = vpack.c.bf16 %v146_v35, %v144_v34  ;;  %v4139_v39 = vpack.c.bf16 %v151_v37, %v149_v36  ;;  %v148_v40 = vld [vmem:[#allocation5 + $0x40] sm:$0xff]  ;;  %v150_v41 = vld [vmem:[#allocation5 + $0x50] sm:$0xff]  ;;  %v153_v42 = vld [vmem:[#allocation5 + $0x68] sm:$0xff]  ;;  %v4186_v18 = vsub.s32 0, %v337_v17  ;;  %v4195_v29 = vsub.s32 1, %v337_v17 }
  0x87   :  { %v155_v43 = vld [vmem:[#allocation5 + $0x78] sm:$0xff]  ;;  %v4142_v44 = vpack.c.bf16 %v150_v41, %v148_v40  ;;  %v152_v46 = vld [vmem:[#allocation5 + $0x60] sm:$0xff]  ;;  %v154_v47 = vld [vmem:[#allocation5 + $0x70] sm:$0xff] }
  0x88   :  { %v4145_v45 = vpack.c.bf16 %v155_v43, %v153_v42  ;;  %v157_v48 = vld [vmem:[#allocation5 + $0x88] sm:$0xff]  ;;  %v159_v49 = vld [vmem:[#allocation5 + $0x98] sm:$0xff]  ;;  %v4148_v50 = vpack.c.bf16 %v154_v47, %v152_v46  ;;  %v156_v52 = vld [vmem:[#allocation5 + $0x80] sm:$0xff] }
  0x89   :  { %2953 = vmatpush1.bf16.msra.mxu0 %v4110_v20  ;;  %3001 = vmatpush1.bf16.msra.mxu1 %v4110_v20  ;;  %v4151_v51 = vpack.c.bf16 %v159_v49, %v157_v48  ;;  %v158_v53 = vld [vmem:[#allocation5 + $0x90] sm:$0xff]  ;;  %v161_v54 = vld [vmem:[#allocation5 + $0xa8] sm:$0xff]  ;;  %v163_v55 = vld [vmem:[#allocation5 + $0xb8] sm:$0xff] }
  0x8a   :  { %2955 = vmatprep.subr.bf16.mxu0 %v4114_v21  ;;  %3003 = vmatprep.subr.bf16.mxu1 %v4114_v21  ;;  %v4154_v56 = vpack.c.bf16 %v158_v53, %v156_v52  ;;  %v4157_v57 = vpack.c.bf16 %v163_v55, %v161_v54  ;;  %v160_v58 = vld [vmem:[#allocation5 + $0xa0] sm:$0xff]  ;;  %v162_v59 = vld [vmem:[#allocation5 + $0xb0] sm:$0xff]  ;;  %v165_v60 = vld [vmem:[#allocation5 + $0xc8] sm:$0xff] }
  0x8b   :  { %v167_v61 = vld [vmem:[#allocation5 + $0xd8] sm:$0xff]  ;;  %v4160_v62 = vpack.c.bf16 %v162_v59, %v160_v58  ;;  %v164_v1 = vld [vmem:[#allocation5 + $0xc0] sm:$0xff]  ;;  %v166_v2 = vld [vmem:[#allocation5 + $0xd0] sm:$0xff] }
  0x8c   :  { %v4163_v63 = vpack.c.bf16 %v167_v61, %v165_v60  ;;  %v169_v3 = vld [vmem:[#allocation5 + $0xe8] sm:$0xff]  ;;  %v171_v5 = vld [vmem:[#allocation5 + $0xf8] sm:$0xff]  ;;  %v4166_v6 = vpack.c.bf16 %v166_v2, %v164_v1  ;;  %v168_v10 = vld [vmem:[#allocation5 + $0xe0] sm:$0xff] }
  0x8d   :  { %2957 = vmatpush1.bf16.msra.mxu0 %v4118_v26  ;;  %3005 = vmatpush1.bf16.msra.mxu1 %v4118_v26  ;;  %v4169_v7 = vpack.c.bf16 %v171_v5, %v169_v3  ;;  %v170_v11 = vld [vmem:[#allocation5 + $0xf0] sm:$0xff]  ;;  %v131_v13 = vld [vmem:[#allocation2] sm:$0xf] }
  0x8e   :  { %2959 = vmatprep.subr.bf16.mxu0 %v4122_v27  ;;  %3007 = vmatprep.subr.bf16.mxu1 %v4122_v27  ;;  %v4172_v12 = vpack.c.bf16 %v170_v11, %v168_v10  ;;  %v188_v19 = vld [vmem:[%s4730_s3] sm:$0x3]  ;;  %v133_v55 = vld [vmem:[#allocation2 + $0x4] sm:$0xf] }
  0x8f   :  { %v4192_v22 = vrot.slane %v188_v19, %v4186_v18  ;;  %v4198_v30 = vrot.slane %v188_v19, %v4195_v29 }
  0x90   :  { %258 = vmatmul.mubr.f32.vlgmr.msra.gmra.mrb[0].mxu0 %v3922_v0 }
  0x91   :  { %2961 = vmatpush1.bf16.msra.mxu0 %v4126_v32  ;;  %328 = vmatprep.mubr.f32.mxu0 %v3922_v0 }
  0x92   :  { %2963 = vmatprep.subr.bf16.mxu0 %v4130_v33 }
  0x95   :  { %2965 = vmatpush1.bf16.msra.mxu0 %v4135_v38 }
  0x96   :  { %2967 = vmatprep.subr.bf16.mxu0 %v4139_v39 }
  0x99   :  { %2969 = vmatpush1.bf16.msra.mxu0 %v4142_v44 }
  0x9a   :  { %2971 = vmatprep.subr.bf16.mxu0 %v4145_v45 }
  0x9d   :  { %2973 = vmatpush1.bf16.msra.mxu0 %v4148_v50 }
  0x9e   :  { %2975 = vmatprep.subr.bf16.mxu0 %v4151_v51 }
  0xa1   :  { %2977 = vmatpush1.bf16.msra.mxu0 %v4154_v56 }
  0xa2   :  { %2979 = vmatprep.subr.bf16.mxu0 %v4157_v57 }
  0xa5   :  { %2981 = vmatpush1.bf16.msra.mxu0 %v4160_v62 }
  0xa6   :  { %2983 = vmatprep.subr.bf16.mxu0 %v4163_v63 }
  0xa9   :  { %2985 = vmatpush1.bf16.msra.mxu0 %v4166_v6 }
  0xaa   :  { %2987 = vmatprep.subr.bf16.mxu0 %v4169_v7 }
  0xad   :  { %2989 = vmatpush1.bf16.msra.mxu0 %v4172_v12 }
  0xae   :  { %3039 = vmatprep.subr.bf16.mxu0 %v4093_v4 }
  0xb0   :  { %329 = vmatmul.mubr.f32.vlgmr.msra.gmra.mrb[0].mxu0 %v131_v13 }
  0xb1   :  { %3041 = vmatpush1.bf16.msra.mxu0 %v4095_v8  ;;  %610 = vmatprep.mubr.f32.mxu0 %v3922_v0 }
  0xb2   :  { %3043 = vmatprep.subr.bf16.mxu0 %v4097_v9 }
  0xb5   :  { %3045 = vmatpush1.bf16.msra.mxu0 %v4102_v14 }
  0xb6   :  { %3047 = vmatprep.subr.bf16.mxu0 %v4106_v15 }
  0xb9   :  { %3049 = vmatpush1.bf16.msra.mxu0 %v4110_v20 }
  0xba   :  { %3051 = vmatprep.subr.bf16.mxu0 %v4114_v21 }
  0xbd   :  { %3053 = vmatpush1.bf16.msra.mxu0 %v4118_v26 }
  0xbe   :  { %3055 = vmatprep.subr.bf16.mxu0 %v4122_v27 }
 0x183   :  { %v330_v23 = vpop.f32.mrb[0].mxu0 }
 0x184   :  { %v346_v24 = vadd.f32 %v4192_v22, %v330_v23  ;;  %v332_v25 = vpop.f32.mrb[1].mxu0 }
 0x185   :  { %v347_v31 = vadd.f32 %v4198_v30, %v332_v25 }
 0x186   :  { %v2890_v28 = vmul.f32 -1.442695, %v346_v24 }
 0x187   :  { %v2891_v41 = vmul.f32 -1.442695, %v347_v31 }
 0x188   :  { %3545 = vpow2.f32 %v2890_v28 }
 0x189   :  { %3547 = vtanh.f32 %v347_v31 }
 0x192   :  { %v3546_v34 = vpop.eup %3545 }
 0x193   :  { %v351_v35 = vadd.f32 1.0, %v3546_v34  ;;  %v3548_v36 = vpop.eup %3547 }
 0x195   :  { %3549 = vrcp.f32 %v351_v35  ;;  %v135_v35 = vld [vmem:[#allocation2 + $0x8] sm:$0xf] }
 0x196   :  { %3551 = vpow2.f32 %v2891_v41 }
 0x19f   :  { %v3550_v37 = vpop.eup %3549 }
 0x1a0   :  { %v362_v40 = vmul.f32 %v3550_v37, %v3548_v36  ;;  %v3552_v42 = vpop.eup %3551  ;;  %v361_v46 = vmul.f32 0.0, %v3550_v37 }
 0x1a1   :  { %v358_v43 = vadd.f32 1.0, %v3552_v42 }
 0x1a2   :  { %364 = vrot.lane.b32.xlu0 %v362_v40, %s3917_s7 }
 0x1a3   :  { %3553 = vrcp.f32 %v358_v43 }
 0x1ad   :  { %v3554_v49 = vpop.eup %3553 }
 0x214   :  { %v365_v47 = vpop.permute.xlu0 %364 }
 0x215   :  { %v367_v48 = vadd.f32 %v365_v47, %v361_v46 }
 0x217   :  { %3555 = vtanh.f32 %v367_v48 }
 0x221   :  { %v3556_v52 = vpop.eup %3555 }
 0x222   :  { %v369_v53 = vmul.f32 %v3556_v52, %v3554_v49 }
 0x224   :  { %371 = vrot.lane.b32.xlu0 %v369_v53, %s3917_s7  ;;  %v1071_v53 = vld [vmem:[#allocation10 + $0x8] sm:$0xff] }
 0x296   :  { %v4203_v54 = vpop.permute.xlu0 %371 }
 0x297   :  { %2892 = vmatmul.mubr.msk.f32.vlgmr.msra.gmra.mrb[0].mxu1 %vm189_vm0, %v4203_v54 }
 0x298   :  { %3009 = vmatpush1.bf16.msra.mxu1 %v4126_v32  ;;  %510 = vmatprep.mubr.f32.mxu1 %v3922_v0 }
 0x299   :  { %3011 = vmatprep.subr.bf16.mxu1 %v4130_v33 }
 0x29c   :  { %3013 = vmatpush1.bf16.msra.mxu1 %v4135_v38 }
 0x29d   :  { %3015 = vmatprep.subr.bf16.mxu1 %v4139_v39 }
 0x2a0   :  { %3017 = vmatpush1.bf16.msra.mxu1 %v4142_v44 }
 0x2a1   :  { %3019 = vmatprep.subr.bf16.mxu1 %v4145_v45 }
 0x2a4   :  { %3021 = vmatpush1.bf16.msra.mxu1 %v4148_v50 }
 0x2a5   :  { %3023 = vmatprep.subr.bf16.mxu1 %v4151_v51 }
 0x2a8   :  { %3025 = vmatpush1.bf16.msra.mxu1 %v4154_v56 }
 0x2a9   :  { %3027 = vmatprep.subr.bf16.mxu1 %v4157_v57 }
 0x2ac   :  { %3029 = vmatpush1.bf16.msra.mxu1 %v4160_v62 }
 0x2ad   :  { %3031 = vmatprep.subr.bf16.mxu1 %v4163_v63 }
 0x2b0   :  { %3033 = vmatpush1.bf16.msra.mxu1 %v4166_v6 }
 0x2b1   :  { %3035 = vmatprep.subr.bf16.mxu1 %v4169_v7 }
 0x2b4   :  { %3037 = vmatpush1.bf16.msra.mxu1 %v4172_v12 }
 0x2b5   :  { %3087 = vmatprep.subr.bf16.mxu1 %v4093_v4 }
 0x2b7   :  { %511 = vmatmul.mubr.f32.vlgmr.msra.gmra.mrb[0].mxu1 %v133_v55  ;;  %v1073_v55 = vld [vmem:[#allocation10 + $0x18] sm:$0xff] }
 0x2b8   :  { %3089 = vmatpush1.bf16.msra.mxu1 %v4095_v8  ;;  %781 = vmatprep.mubr.f32.mxu1 %v3922_v0 }
 0x2b9   :  { %3091 = vmatprep.subr.bf16.mxu1 %v4097_v9 }
 0x2bc   :  { %3093 = vmatpush1.bf16.msra.mxu1 %v4102_v14 }
 0x2bd   :  { %3095 = vmatprep.subr.bf16.mxu1 %v4106_v15 }
 0x2c0   :  { %3097 = vmatpush1.bf16.msra.mxu1 %v4110_v20 }
 0x2c1   :  { %3099 = vmatprep.subr.bf16.mxu1 %v4114_v21 }
 0x2c4   :  { %3101 = vmatpush1.bf16.msra.mxu1 %v4118_v26 }
 0x2c5   :  { %3103 = vmatprep.subr.bf16.mxu1 %v4122_v27 }
 0x38a   :  { %v512_v58 = vpop.f32.mrb[0].mxu1 }
 0x38b   :  { %v517_v59 = vadd.f32 %v512_v58, %v4192_v22  ;;  %v514_v60 = vpop.f32.mrb[1].mxu1  ;;  %v4293_v58 = vpack.c.bf16 %v1073_v55, %v1071_v53  ;;  %v1062_v53 = vld [vmem:[#allocation8 + $0x40] sm:$0xff]  ;;  %v1064_v55 = vld [vmem:[#allocation8 + $0x50] sm:$0xff] }
 0x38c   :  { %v518_v1 = vadd.f32 %v514_v60, %v4198_v30  ;;  %v1072_v60 = vld [vmem:[#allocation10 + $0x10] sm:$0xff] }
 0x38d   :  { %v2893_v61 = vmul.f32 -1.442695, %v517_v59  ;;  %v1070_v59 = vld [vmem:[#allocation10] sm:$0xff] }
 0x38e   :  { %v2894_v13 = vmul.f32 -1.442695, %v518_v1 }
 0x38f   :  { %3557 = vpow2.f32 %v2893_v61  ;;  %v1075_v61 = vld [vmem:[#allocation10 + $0x28] sm:$0xff] }
 0x390   :  { %3559 = vtanh.f32 %v518_v1  ;;  %v1077_v1 = vld [vmem:[#allocation10 + $0x38] sm:$0xff] }
 0x399   :  { %v3558_v2 = vpop.eup %3557 }
 0x39a   :  { %v522_v3 = vadd.f32 1.0, %v3558_v2  ;;  %v3560_v5 = vpop.eup %3559  ;;  %v137_v2 = vld [vmem:[#allocation2 + $0xc] sm:$0xf] }
 0x39c   :  { %3561 = vrcp.f32 %v522_v3  ;;  %v4296_v3 = vpack.c.bf16 %v1072_v60, %v1070_v59  ;;  %v1067_v59 = vld [vmem:[#allocation8 + $0x68] sm:$0xff]  ;;  %v1069_v60 = vld [vmem:[#allocation8 + $0x78] sm:$0xff] }
 0x39d   :  { %3563 = vpow2.f32 %v2894_v13  ;;  %v1079_v13 = vld [vmem:[#allocation10 + $0x48] sm:$0xff] }
 0x3a6   :  { %v3562_v10 = vpop.eup %3561 }
 0x3a7   :  { %v533_v11 = vmul.f32 %v3562_v10, %v3560_v5  ;;  %v3564_v16 = vpop.eup %3563  ;;  %v532_v19 = vmul.f32 %v3562_v10, %v367_v48  ;;  %v4299_v5 = vpack.c.bf16 %v1077_v1, %v1075_v61  ;;  %v1074_v10 = vld [vmem:[#allocation10 + $0x20] sm:$0xff]  ;;  %v4335_v61 = vpack.c.bf16 %v1064_v55, %v1062_v53 }
 0x3a8   :  { %v529_v17 = vadd.f32 1.0, %v3564_v16  ;;  %v1081_v16 = vld [vmem:[#allocation10 + $0x58] sm:$0xff]  ;;  %v4338_v1 = vpack.c.bf16 %v1069_v60, %v1067_v59 }
 0x3a9   :  { %535 = vrot.lane.b32.xlu1 %v533_v11, %s3917_s7  ;;  %v1076_v11 = vld [vmem:[#allocation10 + $0x30] sm:$0xff] }
 0x3aa   :  { %3565 = vrcp.f32 %v529_v17  ;;  %v4302_v17 = vpack.c.bf16 %v1076_v11, %v1074_v10  ;;  %v1068_v10 = vld [vmem:[#allocation8 + $0x70] sm:$0xff] }
 0x3b4   :  { %v3566_v25 = vpop.eup %3565 }
 0x41b   :  { %v536_v23 = vpop.permute.xlu1 %535 }
 0x41c   :  { %v538_v24 = vadd.f32 %v536_v23, %v532_v19  ;;  %v4306_v19 = vpack.c.bf16 %v1081_v16, %v1079_v13  ;;  %v1078_v23 = vld [vmem:[#allocation10 + $0x40] sm:$0xff] }
 0x41e   :  { %3567 = vtanh.f32 %v538_v24 }
 0x428   :  { %v3568_v28 = vpop.eup %3567 }
 0x429   :  { %v540_v31 = vmul.f32 %v3568_v28, %v3566_v25  ;;  %v1083_v25 = vld [vmem:[#allocation10 + $0x68] sm:$0xff]  ;;  %v1085_v28 = vld [vmem:[#allocation10 + $0x78] sm:$0xff] }
 0x42b   :  { %542 = vrot.lane.b32.xlu1 %v540_v31, %s3917_s7 }
 0x49d   :  { %v4237_v34 = vpop.permute.xlu1 %542 }
 0x49e   :  { %2895 = vmatmul.mubr.msk.f32.vlgmr.msra.gmra.mrb[2].mxu0 %vm189_vm0, %v4237_v34 }
 0x49f   :  { %3057 = vmatpush1.bf16.msra.mxu0 %v4126_v32  ;;  %681 = vmatprep.mubr.f32.mxu0 %v3922_v0 }
 0x4a0   :  { %3059 = vmatprep.subr.bf16.mxu0 %v4130_v33 }
 0x4a3   :  { %3061 = vmatpush1.bf16.msra.mxu0 %v4135_v38 }
 0x4a4   :  { %3063 = vmatprep.subr.bf16.mxu0 %v4139_v39 }
 0x4a7   :  { %3065 = vmatpush1.bf16.msra.mxu0 %v4142_v44 }
 0x4a8   :  { %3067 = vmatprep.subr.bf16.mxu0 %v4145_v45 }
 0x4ab   :  { %3069 = vmatpush1.bf16.msra.mxu0 %v4148_v50 }
 0x4ac   :  { %3071 = vmatprep.subr.bf16.mxu0 %v4151_v51 }
 0x4af   :  { %3073 = vmatpush1.bf16.msra.mxu0 %v4154_v56 }
 0x4b0   :  { %3075 = vmatprep.subr.bf16.mxu0 %v4157_v57 }
 0x4b3   :  { %3077 = vmatpush1.bf16.msra.mxu0 %v4160_v62 }
 0x4b4   :  { %3079 = vmatprep.subr.bf16.mxu0 %v4163_v63 }
 0x4b7   :  { %3081 = vmatpush1.bf16.msra.mxu0 %v4166_v6 }
 0x4b8   :  { %3083 = vmatprep.subr.bf16.mxu0 %v4169_v7 }
 0x4bb   :  { %3085 = vmatpush1.bf16.msra.mxu0 %v4172_v12 }
 0x4bc   :  { %3135 = vmatprep.subr.bf16.mxu0 %v4093_v4 }
 0x4be   :  { %682 = vmatmul.mubr.f32.vlgmr.msra.gmra.mrb[2].mxu0 %v135_v35  ;;  %v4312_v35 = vpack.c.bf16 %v1085_v28, %v1083_v25 }
 0x4bf   :  { %3137 = vmatpush1.bf16.msra.mxu0 %v4095_v8  ;;  %952 = vmatprep.mubr.f32.mxu0 %v3922_v0 }
 0x4c0   :  { %3139 = vmatprep.subr.bf16.mxu0 %v4097_v9 }
 0x4c3   :  { %3141 = vmatpush1.bf16.msra.mxu0 %v4102_v14 }
 0x4c4   :  { %3143 = vmatprep.subr.bf16.mxu0 %v4106_v15 }
 0x4c7   :  { %3145 = vmatpush1.bf16.msra.mxu0 %v4110_v20 }
 0x4c8   :  { %3147 = vmatprep.subr.bf16.mxu0 %v4114_v21 }
 0x4cb   :  { %3149 = vmatpush1.bf16.msra.mxu0 %v4118_v26 }
 0x4cc   :  { %3151 = vmatprep.subr.bf16.mxu0 %v4122_v27 }
 0x591   :  { %v683_v4 = vpop.f32.mrb[2].mxu0 }
 0x592   :  { %v688_v36 = vadd.f32 %v683_v4, %v4192_v22  ;;  %v685_v8 = vpop.f32.mrb[3].mxu0  ;;  %v1082_v4 = vld [vmem:[#allocation10 + $0x60] sm:$0xff] }
 0x593   :  { %v689_v9 = vadd.f32 %v685_v8, %v4198_v30  ;;  %v1055_v8 = vld [vmem:[#allocation8 + $0x8] sm:$0xff] }
 0x594   :  { %v2896_v37 = vmul.f32 -1.442695, %v688_v36  ;;  %v1084_v36 = vld [vmem:[#allocation10 + $0x70] sm:$0xff] }
 0x595   :  { %v2897_v21 = vmul.f32 -1.442695, %v689_v9 }
 0x596   :  { %3569 = vpow2.f32 %v2896_v37  ;;  %v1057_v37 = vld [vmem:[#allocation8 + $0x18] sm:$0xff] }
 0x597   :  { %3571 = vtanh.f32 %v689_v9  ;;  %v4315_v9 = vpack.c.bf16 %v1084_v36, %v1082_v4  ;;  %v1086_v4 = vld [vmem:[%s4733_s6] sm:$0x3] }
 0x5a0   :  { %v3570_v40 = vpop.eup %3569 }
 0x5a1   :  { %v693_v14 = vadd.f32 1.0, %v3570_v40  ;;  %v3572_v15 = vpop.eup %3571  ;;  %v4318_v40 = vpack.c.bf16 %v1057_v37, %v1055_v8  ;;  %v4363_v37 = vrot.slane %v1086_v4, %v4186_v18 }
 0x5a3   :  { %3573 = vrcp.f32 %v693_v14  ;;  %v1054_v14 = vld [vmem:[#allocation8] sm:$0xff] }
 0x5a4   :  { %3575 = vpow2.f32 %v2897_v21 }
 0x5ad   :  { %v3574_v20 = vpop.eup %3573 }
 0x5ae   :  { %v704_v41 = vmul.f32 %v3574_v20, %v3572_v15  ;;  %v3576_v26 = vpop.eup %3575  ;;  %v703_v42 = vmul.f32 %v3574_v20, %v538_v24  ;;  %v1080_v24 = vld [vmem:[#allocation10 + $0x50] sm:$0xff]  ;;  %v1059_v20 = vld [vmem:[#allocation8 + $0x28] sm:$0xff] }
 0x5af   :  { %v700_v27 = vadd.f32 1.0, %v3576_v26  ;;  %v4309_v31 = vpack.c.bf16 %v1080_v24, %v1078_v23  ;;  %v1056_v15 = vld [vmem:[#allocation8 + $0x10] sm:$0xff] }
 0x5b0   :  { %706 = vrot.lane.b32.xlu0 %v704_v41, %s3917_s7  ;;  %v1061_v41 = vld [vmem:[#allocation8 + $0x38] sm:$0xff]  ;;  %v4321_v21 = vpack.c.bf16 %v1056_v15, %v1054_v14 }
 0x5b1   :  { %3577 = vrcp.f32 %v700_v27  ;;  %v4324_v26 = vpack.c.bf16 %v1061_v41, %v1059_v20  ;;  %v1058_v27 = vld [vmem:[#allocation8 + $0x20] sm:$0xff] }
 0x5bb   :  { %v3578_v47 = vpop.eup %3577 }
 0x622   :  { %v707_v43 = vpop.permute.xlu0 %706 }
 0x623   :  { %v4270_v46 = vadd.f32 %v707_v43, %v703_v42  ;;  %v1060_v42 = vld [vmem:[#allocation8 + $0x30] sm:$0xff]  ;;  %v1063_v43 = vld [vmem:[#allocation8 + $0x48] sm:$0xff] }
 0x625   :  { %3579 = vtanh.f32 %v4270_v46 }
 0x62f   :  { %v3580_v48 = vpop.eup %3579 }
 0x630   :  { %v711_v49 = vmul.f32 %v3580_v48, %v3578_v47  ;;  %v1065_v47 = vld [vmem:[#allocation8 + $0x58] sm:$0xff]  ;;  %v4328_v48 = vpack.c.bf16 %v1060_v42, %v1058_v27  ;;  %v4367_v42 = vrot.slane %v1086_v4, %v4195_v29 }
 0x632   :  { %713 = vrot.lane.b32.xlu1 %v711_v49, %s3917_s7  ;;  %v4332_v49 = vpack.c.bf16 %v1065_v47, %v1063_v43 }
 0x6a4   :  { %v4274_v52 = vpop.permute.xlu1 %713 }
 0x6a5   :  { %2898 = vmatmul.mubr.msk.f32.vlgmr.msra.gmra.mrb[2].mxu1 %vm189_vm0, %v4274_v52 }
 0x6a6   :  { %3105 = vmatpush1.bf16.msra.mxu1 %v4126_v32  ;;  %852 = vmatprep.mubr.f32.mxu1 %v3922_v0 }
 0x6a7   :  { %3107 = vmatprep.subr.bf16.mxu1 %v4130_v33 }
 0x6aa   :  { %3109 = vmatpush1.bf16.msra.mxu1 %v4135_v38 }
 0x6ab   :  { %3111 = vmatprep.subr.bf16.mxu1 %v4139_v39 }
 0x6ae   :  { %3113 = vmatpush1.bf16.msra.mxu1 %v4142_v44 }
 0x6af   :  { %3115 = vmatprep.subr.bf16.mxu1 %v4145_v45 }
 0x6b2   :  { %3117 = vmatpush1.bf16.msra.mxu1 %v4148_v50 }
 0x6b3   :  { %3119 = vmatprep.subr.bf16.mxu1 %v4151_v51 }
 0x6b6   :  { %3121 = vmatpush1.bf16.msra.mxu1 %v4154_v56 }
 0x6b7   :  { %3123 = vmatprep.subr.bf16.mxu1 %v4157_v57 }
 0x6ba   :  { %3125 = vmatpush1.bf16.msra.mxu1 %v4160_v62 }
 0x6bb   :  { %3127 = vmatprep.subr.bf16.mxu1 %v4163_v63 }
 0x6be   :  { %3129 = vmatpush1.bf16.msra.mxu1 %v4166_v6 }
 0x6bf   :  { %3131 = vmatprep.subr.bf16.mxu1 %v4169_v7 }
 0x6c2   :  { %3133 = vmatpush1.bf16.msra.mxu1 %v4172_v12 }
 0x6c3   :  { %3183 = vmatprep.subr.bf16.mxu1 %v4293_v58 }
 0x6c5   :  { %853 = vmatmul.mubr.f32.vlgmr.msra.gmra.mrb[2].mxu1 %v137_v2  ;;  %v1066_v2 = vld [vmem:[#allocation8 + $0x60] sm:$0xff] }
 0x6c6   :  { %3185 = vmatpush1.bf16.msra.mxu1 %v4296_v3  ;;  %1151 = vmatprep.mubr.f32.mxu1 %v3922_v0  ;;  %v4341_v11 = vpack.c.bf16 %v1068_v10, %v1066_v2 }
 0x6c7   :  { %3187 = vmatprep.subr.bf16.mxu1 %v4299_v5 }
 0x6ca   :  { %3189 = vmatpush1.bf16.msra.mxu1 %v4302_v17 }
 0x6cb   :  { %3191 = vmatprep.subr.bf16.mxu1 %v4306_v19 }
 0x6ce   :  { %3193 = vmatpush1.bf16.msra.mxu1 %v4309_v31 }
 0x6cf   :  { %3195 = vmatprep.subr.bf16.mxu1 %v4312_v35 }
 0x6d2   :  { %3197 = vmatpush1.bf16.msra.mxu1 %v4315_v9 }
 0x6d3   :  { %3199 = vmatprep.subr.bf16.mxu1 %v4318_v40 }
 0x6d5   :  { %1152 = vmatmul.mubr.f32.vlgmr.msra.gmra.mrb[4].mxu1 %v3922_v0 }
 0x6d6   :  { %3201 = vmatpush1.bf16.msra.mxu1 %v4321_v21  ;;  %1222 = vmatprep.mubr.f32.mxu1 %v3922_v0 }
 0x6d7   :  { %3203 = vmatprep.subr.bf16.mxu1 %v4324_v26 }
 0x6da   :  { %3205 = vmatpush1.bf16.msra.mxu1 %v4328_v48 }
 0x6db   :  { %3207 = vmatprep.subr.bf16.mxu1 %v4332_v49 }
 0x6de   :  { %3209 = vmatpush1.bf16.msra.mxu1 %v4335_v61 }
 0x6df   :  { %3211 = vmatprep.subr.bf16.mxu1 %v4338_v1 }
 0x6e2   :  { %3213 = vmatpush1.bf16.msra.mxu1 %v4341_v11 }
 0x6e3   :  { %3215 = vmatprep.subr.bf16.mxu1 %v4293_v58 }
 0x6e5   :  { %2904 = vmatmul.mubr.msk.f32.vlgmr.msra.gmra.mrb[4].mxu1 %vm189_vm0, %v4203_v54 }
 0x6e6   :  { %3217 = vmatpush1.bf16.msra.mxu1 %v4296_v3  ;;  %1333 = vmatprep.mubr.f32.mxu1 %v3922_v0 }
 0x6e7   :  { %3219 = vmatprep.subr.bf16.mxu1 %v4299_v5 }
 0x6ea   :  { %3221 = vmatpush1.bf16.msra.mxu1 %v4302_v17 }
 0x6eb   :  { %3223 = vmatprep.subr.bf16.mxu1 %v4306_v19 }
 0x6ee   :  { %3225 = vmatpush1.bf16.msra.mxu1 %v4309_v31 }
 0x6ef   :  { %3227 = vmatprep.subr.bf16.mxu1 %v4312_v35 }
 0x6f2   :  { %3229 = vmatpush1.bf16.msra.mxu1 %v4315_v9 }
 0x6f3   :  { %3231 = vmatprep.subr.bf16.mxu1 %v4318_v40 }
 0x798   :  { %v854_v13 = vpop.f32.mrb[2].mxu1 }
 0x799   :  { %v859_v54 = vadd.f32 %v854_v13, %v4192_v22  ;;  %v856_v16 = vpop.f32.mrb[3].mxu1 }
 0x79a   :  { %v860_v24 = vadd.f32 %v856_v16, %v4198_v30 }
 0x79b   :  { %v2899_v23 = vmul.f32 -1.442695, %v859_v54 }
 0x79c   :  { %v2900_v10 = vmul.f32 -1.442695, %v860_v24 }
 0x79d   :  { %3581 = vpow2.f32 %v2899_v23 }
 0x79e   :  { %3583 = vtanh.f32 %v860_v24 }
 0x7a7   :  { %v3582_v25 = vpop.eup %3581 }
 0x7a8   :  { %v864_v28 = vadd.f32 1.0, %v3582_v25  ;;  %v3584_v36 = vpop.eup %3583 }
 0x7aa   :  { %3585 = vrcp.f32 %v864_v28 }
 0x7b4   :  { %v3586_v8 = vpop.eup %3585 }
 0x7b5   :  { %v875_v14 = vmul.f32 %v3586_v8, %v3584_v36  ;;  %v874_v36 = vmul.f32 %v3586_v8, %v4270_v46 }
 0x7b8   :  { %v1224_v15 = vpop.f32.mrb[4].mxu1 }
 0x7b9   :  { %v1240_v20 = vadd.f32 %v4363_v37, %v1224_v15  ;;  %v1226_v41 = vpop.f32.mrb[5].mxu1 }
 0x7ba   :  { %v1241_v43 = vadd.f32 %v4367_v42, %v1226_v41 }
 0x7bb   :  { %v2905_v27 = vmul.f32 -1.442695, %v1240_v20 }
 0x7bc   :  { %v2906_v2 = vmul.f32 -1.442695, %v1241_v43 }
 0x7bd   :  { %3587 = vpow2.f32 %v2905_v27 }
 0x7be   :  { %3589 = vtanh.f32 %v1241_v43 }
 0x7c7   :  { %v3588_v47 = vpop.eup %3587 }
 0x7c8   :  { %v1245_v53 = vadd.f32 1.0, %v3588_v47  ;;  %v3590_v55 = vpop.eup %3589 }
 0x7ca   :  { %3591 = vrcp.f32 %v1245_v53 }
 0x7cb   :  { %3593 = vpow2.f32 %v2906_v2 }
 0x7cc   :  { %3595 = vpow2.f32 %v2900_v10 }
 0x7d4   :  { %v3592_v59 = vpop.eup %3591 }
 0x7d5   :  { %v1256_v60 = vmul.f32 %v3592_v59, %v3590_v55  ;;  %v3594_v13 = vpop.eup %3593  ;;  %v1255_v23 = vmul.f32 0.0, %v3592_v59 }
 0x7d6   :  { %v1252_v54 = vadd.f32 1.0, %v3594_v13  ;;  %v3596_v16 = vpop.eup %3595 }
 0x7d7   :  { %1258 = vrot.lane.b32.xlu0 %v1256_v60, %s3917_s7  ;;  %v871_v4 = vadd.f32 1.0, %v3596_v16 }
 0x7d8   :  { %3597 = vrcp.f32 %v1252_v54 }
 0x7db   :  { %877 = vrot.lane.b32.xlu0 %v875_v14, %s3917_s7 }
 0x7e2   :  { %v3598_v24 = vpop.eup %3597 }
 0x849   :  { %v1259_v25 = vpop.permute.xlu0 %1258 }
 0x84a   :  { %v4372_v28 = vadd.f32 %v1259_v25, %v1255_v23 }
 0x84c   :  { %3599 = vtanh.f32 %v4372_v28 }
 0x84d   :  { %v878_v15 = vpop.permute.xlu0 %877  ;;  %3601 = vrcp.f32 %v871_v4 }
 0x84e   :  { %v4376_v20 = vadd.f32 %v878_v15, %v874_v36 }
 0x850   :  { %3603 = vtanh.f32 %v4376_v20 }
 0x856   :  { %v3600_v14 = vpop.eup %3599 }
 0x857   :  { %v1263_v41 = vmul.f32 %v3600_v14, %v3598_v24  ;;  %v3602_v27 = vpop.eup %3601 }
 0x859   :  { %1265 = vrot.lane.b32.xlu1 %v1263_v41, %s3917_s7 }
 0x85a   :  { %v3604_v43 = vpop.eup %3603 }
 0x85b   :  { %v882_v47 = vmul.f32 %v3604_v43, %v3602_v27 }
 0x85d   :  { %884 = vrot.lane.b32.xlu0 %v882_v47, %s3917_s7 }
 0x8cb   :  { %v4381_v53 = vpop.permute.xlu1 %1265 }
 0x8cc   :  { %2907 = vmatmul.mubr.msk.f32.vlgmr.msra.gmra.mrb[6].mxu1 %vm189_vm0, %v4381_v53 }
 0x8cd   :  { %3233 = vmatpush1.bf16.msra.mxu1 %v4321_v21  ;;  %1404 = vmatprep.mubr.f32.mxu1 %v3922_v0 }
 0x8ce   :  { %3235 = vmatprep.subr.bf16.mxu1 %v4324_v26 }
 0x8cf   :  { %v4388_v46 = vpop.permute.xlu0 %884 }
 0x8d0   :  { %2901 = vmatmul.mubr.msk.f32.vlgmr.msra.gmra.mrb[4].mxu0 %vm189_vm0, %v4388_v46 }
 0x8d1   :  { %3153 = vmatpush1.bf16.msra.mxu0 %v4126_v32  ;;  %3237 = vmatpush1.bf16.msra.mxu1 %v4328_v48  ;;  %v139_v32 = vld [vmem:[#allocation2 + $0x10] sm:$0xf] }
 0x8d2   :  { %3155 = vmatprep.subr.bf16.mxu0 %v4130_v33  ;;  %3239 = vmatprep.subr.bf16.mxu1 %v4332_v49 }
 0x8d3   :  { %1023 = vmatprep.mubr.f32.mxu0 %v3922_v0 }
 0x8d5   :  { %3157 = vmatpush1.bf16.msra.mxu0 %v4135_v38  ;;  %3241 = vmatpush1.bf16.msra.mxu1 %v4335_v61 }
 0x8d6   :  { %3159 = vmatprep.subr.bf16.mxu0 %v4139_v39  ;;  %3243 = vmatprep.subr.bf16.mxu1 %v4338_v1 }
 0x8d9   :  { %3161 = vmatpush1.bf16.msra.mxu0 %v4142_v44  ;;  %3245 = vmatpush1.bf16.msra.mxu1 %v4341_v11 }
 0x8da   :  { %3163 = vmatprep.subr.bf16.mxu0 %v4145_v45  ;;  %3279 = vmatprep.subr.bf16.mxu1 %v4293_v58 }
 0x8dc   :  { %2908 = vmatmul.mubr.msk.f32.vlgmr.msra.gmra.mrb[6].mxu1 %vm189_vm0, %v4237_v34 }
 0x8dd   :  { %3165 = vmatpush1.bf16.msra.mxu0 %v4148_v50  ;;  %3281 = vmatpush1.bf16.msra.mxu1 %v4296_v3 }
 0x8de   :  { %3167 = vmatprep.subr.bf16.mxu0 %v4151_v51  ;;  %3283 = vmatprep.subr.bf16.mxu1 %v4299_v5 }
 0x8df   :  { %1675 = vmatprep.mubr.f32.mxu1 %v3922_v0 }
 0x8e1   :  { %3169 = vmatpush1.bf16.msra.mxu0 %v4154_v56  ;;  %3285 = vmatpush1.bf16.msra.mxu1 %v4302_v17 }
 0x8e2   :  { %3171 = vmatprep.subr.bf16.mxu0 %v4157_v57  ;;  %3287 = vmatprep.subr.bf16.mxu1 %v4306_v19 }
 0x8e5   :  { %3173 = vmatpush1.bf16.msra.mxu0 %v4160_v62  ;;  %3289 = vmatpush1.bf16.msra.mxu1 %v4309_v31 }
 0x8e6   :  { %3175 = vmatprep.subr.bf16.mxu0 %v4163_v63  ;;  %3291 = vmatprep.subr.bf16.mxu1 %v4312_v35 }
 0x8e9   :  { %3177 = vmatpush1.bf16.msra.mxu0 %v4166_v6  ;;  %3293 = vmatpush1.bf16.msra.mxu1 %v4315_v9 }
 0x8ea   :  { %3179 = vmatprep.subr.bf16.mxu0 %v4169_v7  ;;  %3295 = vmatprep.subr.bf16.mxu1 %v4318_v40 }
 0x8ed   :  { %3181 = vmatpush1.bf16.msra.mxu0 %v4172_v12 }
 0x8ee   :  { %3247 = vmatprep.subr.bf16.mxu0 %v4293_v58 }
 0x8f0   :  { %1024 = vmatmul.mubr.f32.vlgmr.msra.gmra.mrb[4].mxu0 %v139_v32 }
 0x8f1   :  { %3249 = vmatpush1.bf16.msra.mxu0 %v4296_v3  ;;  %1504 = vmatprep.mubr.f32.mxu0 %v3922_v0 }
 0x8f2   :  { %3251 = vmatprep.subr.bf16.mxu0 %v4299_v5 }
 0x8f5   :  { %3253 = vmatpush1.bf16.msra.mxu0 %v4302_v17 }
 0x8f6   :  { %3255 = vmatprep.subr.bf16.mxu0 %v4306_v19 }
 0x8f9   :  { %3257 = vmatpush1.bf16.msra.mxu0 %v4309_v31 }
 0x8fa   :  { %3259 = vmatprep.subr.bf16.mxu0 %v4312_v35 }
 0x8fd   :  { %3261 = vmatpush1.bf16.msra.mxu0 %v4315_v9 }
 0x8fe   :  { %3263 = vmatprep.subr.bf16.mxu0 %v4318_v40 }
 0x9af   :  { %v1406_v33 = vpop.f32.mrb[6].mxu1 }
 0x9b0   :  { %v1411_v38 = vadd.f32 %v1406_v33, %v4363_v37  ;;  %v1408_v39 = vpop.f32.mrb[7].mxu1 }
 0x9b1   :  { %v1412_v45 = vadd.f32 %v1408_v39, %v4367_v42 }
 0x9b2   :  { %v2909_v44 = vmul.f32 -1.442695, %v1411_v38 }
 0x9b3   :  { %v2910_v2 = vmul.f32 -1.442695, %v1412_v45 }
 0x9b4   :  { %3605 = vpow2.f32 %v2909_v44 }
 0x9b5   :  { %3607 = vtanh.f32 %v1412_v45 }
 0x9be   :  { %v3606_v50 = vpop.eup %3605 }
 0x9bf   :  { %v1416_v51 = vadd.f32 1.0, %v3606_v50  ;;  %v3608_v6 = vpop.eup %3607 }
 0x9c1   :  { %3609 = vrcp.f32 %v1416_v51 }
 0x9c3   :  { %v1025_v56 = vpop.f32.mrb[4].mxu0 }
 0x9c4   :  { %v1030_v57 = vadd.f32 %v1025_v56, %v4192_v22  ;;  %v1027_v62 = vpop.f32.mrb[5].mxu0  ;;  %v1970_v56 = vld [vmem:[#allocation13 + $0x8] sm:$0xff] }
 0x9c5   :  { %v4440_v34 = vadd.f32 %v1027_v62, %v4198_v30 }
 0x9c6   :  { %v2902_v63 = vmul.f32 -1.442695, %v1030_v57  ;;  %v1972_v57 = vld [vmem:[#allocation13 + $0x18] sm:$0xff] }
 0x9c7   :  { %v2903_v33 = vmul.f32 -1.442695, %v4440_v34  ;;  %v4494_v62 = vpack.c.bf16 %v1972_v57, %v1970_v56  ;;  %v1965_v56 = vld [vmem:[#allocation11 + $0x60] sm:$0xff]  ;;  %v1967_v57 = vld [vmem:[#allocation11 + $0x70] sm:$0xff] }
 0x9c8   :  { %3611 = vpow2.f32 %v2902_v63  ;;  %v1969_v63 = vld [vmem:[#allocation13] sm:$0xff] }
 0x9c9   :  { %3613 = vtanh.f32 %v4440_v34 }
 0x9cb   :  { %v3610_v7 = vpop.eup %3609 }
 0x9cc   :  { %v1427_v12 = vmul.f32 %v3610_v7, %v3608_v6  ;;  %v1426_v54 = vmul.f32 %v3610_v7, %v4372_v28  ;;  %v1971_v6 = vld [vmem:[#allocation13 + $0x10] sm:$0xff]  ;;  %v1974_v7 = vld [vmem:[#allocation13 + $0x28] sm:$0xff] }
 0x9ce   :  { %1429 = vrot.lane.b32.xlu1 %v1427_v12, %s3917_s7  ;;  %v4497_v12 = vpack.c.bf16 %v1971_v6, %v1969_v63  ;;  %v4546_v63 = vpack.c.bf16 %v1967_v57, %v1965_v56 }
 0x9d2   :  { %v3612_v8 = vpop.eup %3611 }
 0x9d3   :  { %v1035_v55 = vadd.f32 1.0, %v3612_v8  ;;  %v3614_v59 = vpop.eup %3613  ;;  %v1973_v8 = vld [vmem:[#allocation13 + $0x20] sm:$0xff] }
 0x9d5   :  { %3615 = vrcp.f32 %v1035_v55  ;;  %v1975_v55 = vld [vmem:[#allocation13 + $0x30] sm:$0xff] }
 0x9d6   :  { %3617 = vpow2.f32 %v2910_v2 }
 0x9df   :  { %v4443_v60 = vpop.eup %3615 }
 0x9e0   :  { %v1046_v22 = vmul.f32 %v4443_v60, %v3614_v59  ;;  %v3618_v10 = vpop.eup %3617  ;;  %v1045_v45 = vmul.f32 %v4443_v60, %v4376_v20  ;;  %v1976_v20 = vld [vmem:[#allocation13 + $0x38] sm:$0xff]  ;;  %v1978_v60 = vld [vmem:[#allocation13 + $0x48] sm:$0xff] }
 0x9e1   :  { %v1423_v13 = vadd.f32 1.0, %v3618_v10  ;;  %v4500_v34 = vpack.c.bf16 %v1976_v20, %v1974_v7  ;;  %v4505_v10 = vpack.c.bf16 %v1975_v55, %v1973_v8 }
 0x9e3   :  { %3619 = vrcp.f32 %v1423_v13 }
 0x9ed   :  { %v3620_v30 = vpop.eup %3619 }
 0xa40   :  { %v1430_v16 = vpop.permute.xlu1 %1429 }
 0xa41   :  { %v1432_v23 = vadd.f32 %v1430_v16, %v1426_v54  ;;  %v1977_v16 = vld [vmem:[#allocation13 + $0x40] sm:$0xff] }
 0xa43   :  { %3621 = vtanh.f32 %v1432_v23 }
 0xa4d   :  { %v3622_v25 = vpop.eup %3621 }
 0xa4e   :  { %v1434_v4 = vmul.f32 %v3622_v25, %v3620_v30  ;;  %v1982_v30 = vld [vmem:[#allocation13 + $0x68] sm:$0xff]  ;;  %v1984_v25 = vld [vmem:[#allocation13 + $0x78] sm:$0xff] }
 0xa50   :  { %1436 = vrot.lane.b32.xlu1 %v1434_v4, %s3917_s7 }
 0xac2   :  { %v4448_v36 = vpop.permute.xlu1 %1436 }
 0xac3   :  { %2911 = vmatmul.mubr.msk.f32.vlgmr.msra.gmra.mrb[6].mxu0 %vm189_vm0, %v4448_v36 }
 0xac4   :  { %3265 = vmatpush1.bf16.msra.mxu0 %v4321_v21  ;;  %1575 = vmatprep.mubr.f32.mxu0 %v3922_v0 }
 0xac5   :  { %3267 = vmatprep.subr.bf16.mxu0 %v4324_v26 }
 0xac8   :  { %3269 = vmatpush1.bf16.msra.mxu0 %v4328_v48 }
 0xac9   :  { %3271 = vmatprep.subr.bf16.mxu0 %v4332_v49 }
 0xacc   :  { %3273 = vmatpush1.bf16.msra.mxu0 %v4335_v61 }
 0xacd   :  { %3275 = vmatprep.subr.bf16.mxu0 %v4338_v1 }
 0xad0   :  { %3277 = vmatpush1.bf16.msra.mxu0 %v4341_v11 }
 0xad1   :  { %3311 = vmatprep.subr.bf16.mxu0 %v4293_v58 }
 0xad3   :  { %2912 = vmatmul.mubr.msk.f32.vlgmr.msra.gmra.mrb[6].mxu0 %vm189_vm0, %v4274_v52 }
 0xad4   :  { %3313 = vmatpush1.bf16.msra.mxu0 %v4296_v3  ;;  %1846 = vmatprep.mubr.f32.mxu0 %v3922_v0 }
 0xad5   :  { %3315 = vmatprep.subr.bf16.mxu0 %v4299_v5 }
 0xad8   :  { %3317 = vmatpush1.bf16.msra.mxu0 %v4302_v17 }
 0xad9   :  { %3319 = vmatprep.subr.bf16.mxu0 %v4306_v19 }
 0xadc   :  { %3321 = vmatpush1.bf16.msra.mxu0 %v4309_v31 }
 0xadd   :  { %3323 = vmatprep.subr.bf16.mxu0 %v4312_v35 }
 0xae0   :  { %3325 = vmatpush1.bf16.msra.mxu0 %v4315_v9 }
 0xae1   :  { %3327 = vmatprep.subr.bf16.mxu0 %v4318_v40 }
 0xba6   :  { %v1577_v58 = vpop.f32.mrb[6].mxu0 }
 0xba7   :  { %v1582_v52 = vadd.f32 %v1577_v58, %v4363_v37  ;;  %v1579_v3 = vpop.f32.mrb[7].mxu0  ;;  %v1981_v58 = vld [vmem:[#allocation13 + $0x60] sm:$0xff] }
 0xba8   :  { %v1583_v5 = vadd.f32 %v1579_v3, %v4367_v42  ;;  %v1954_v3 = vld [vmem:[#allocation11 + $0x8] sm:$0xff] }
 0xba9   :  { %v2913_v28 = vmul.f32 -1.442695, %v1582_v52  ;;  %v1983_v52 = vld [vmem:[#allocation13 + $0x70] sm:$0xff] }
 0xbaa   :  { %v2914_v35 = vmul.f32 -1.442695, %v1583_v5 }
 0xbab   :  { %3623 = vpow2.f32 %v2913_v28  ;;  %v1956_v28 = vld [vmem:[#allocation11 + $0x18] sm:$0xff] }
 0xbac   :  { %3625 = vtanh.f32 %v1583_v5  ;;  %v4520_v5 = vpack.c.bf16 %v1983_v52, %v1981_v58 }
 0xbb5   :  { %v3624_v15 = vpop.eup %3623 }
 0xbb6   :  { %v1587_v17 = vadd.f32 1.0, %v3624_v15  ;;  %v3626_v19 = vpop.eup %3625  ;;  %v4523_v15 = vpack.c.bf16 %v1956_v28, %v1954_v3 }
 0xbb8   :  { %3627 = vrcp.f32 %v1587_v17  ;;  %v1953_v17 = vld [vmem:[#allocation11] sm:$0xff] }
 0xbb9   :  { %3629 = vpow2.f32 %v2914_v35 }
 0xbc2   :  { %v3628_v31 = vpop.eup %3627 }
 0xbc3   :  { %v1598_v24 = vmul.f32 %v3628_v31, %v3626_v19  ;;  %v3630_v9 = vpop.eup %3629  ;;  %v1597_v14 = vmul.f32 %v3628_v31, %v1432_v23  ;;  %v1979_v23 = vld [vmem:[#allocation13 + $0x50] sm:$0xff]  ;;  %v1958_v31 = vld [vmem:[#allocation11 + $0x28] sm:$0xff] }
 0xbc4   :  { %v1594_v40 = vadd.f32 1.0, %v3630_v9  ;;  %v4514_v4 = vpack.c.bf16 %v1979_v23, %v1977_v16  ;;  %v1955_v19 = vld [vmem:[#allocation11 + $0x10] sm:$0xff] }
 0xbc5   :  { %1600 = vrot.lane.b32.xlu0 %v1598_v24, %s3917_s7  ;;  %v1960_v24 = vld [vmem:[#allocation11 + $0x38] sm:$0xff]  ;;  %v4526_v35 = vpack.c.bf16 %v1955_v19, %v1953_v17 }
 0xbc6   :  { %3631 = vrcp.f32 %v1594_v40  ;;  %v4529_v9 = vpack.c.bf16 %v1960_v24, %v1958_v31  ;;  %v1957_v40 = vld [vmem:[#allocation11 + $0x20] sm:$0xff] }
 0xbd0   :  { %v3632_v43 = vpop.eup %3631 }
 0xc37   :  { %v1601_v41 = vpop.permute.xlu0 %1600 }
 0xc38   :  { %v4475_v27 = vadd.f32 %v1601_v41, %v1597_v14  ;;  %v1959_v14 = vld [vmem:[#allocation11 + $0x30] sm:$0xff]  ;;  %v1962_v41 = vld [vmem:[#allocation11 + $0x48] sm:$0xff] }
 0xc3a   :  { %3633 = vtanh.f32 %v4475_v27 }
 0xc3b   :  { %3635 = vpow2.f32 %v2903_v33  ;;  %v1961_v33 = vld [vmem:[#allocation11 + $0x40] sm:$0xff] }
 0xc44   :  { %v3634_v47 = vpop.eup %3633 }
 0xc45   :  { %v1605_v32 = vmul.f32 %v3634_v47, %v3632_v43  ;;  %v3636_v38 = vpop.eup %3635  ;;  %v1964_v43 = vld [vmem:[#allocation11 + $0x58] sm:$0xff]  ;;  %v4533_v47 = vpack.c.bf16 %v1959_v14, %v1957_v40 }
 0xc46   :  { %v1042_v44 = vadd.f32 1.0, %v3636_v38  ;;  %v1963_v38 = vld [vmem:[#allocation11 + $0x50] sm:$0xff] }
 0xc47   :  { %1607 = vrot.lane.b32.xlu1 %v1605_v32, %s3917_s7  ;;  %v4537_v32 = vpack.c.bf16 %v1964_v43, %v1962_v41 }
 0xc48   :  { %3637 = vrcp.f32 %v1042_v44  ;;  %v1966_v44 = vld [vmem:[#allocation11 + $0x68] sm:$0xff] }
 0xc4b   :  { %1048 = vrot.lane.b32.xlu1 %v1046_v22, %s3917_s7  ;;  %v1980_v22 = vld [vmem:[#allocation13 + $0x58] sm:$0xff] }
 0xc4c   :  { %v4511_v54 = vpack.c.bf16 %v1980_v22, %v1978_v60  ;;  %v1985_v60 = vld [vmem:[%s4736_s9] sm:$0x3]  ;;  %s3923_s9 = smov [#allocation14]  }
 0xc4d   :  { %v4568_v23 = vrot.slane %v1985_v60, %v4186_v18  ;;  %v4573_v3 = vrot.slane %v1985_v60, %v4195_v29  ;;  %s2875_s14 = sshll.u32 %s3923_s9, 4  ;;  %s2876_s14 = int_to_ptr.vmem [resolvable:$true] %s2875_s14 }
 0xc4e   :  { %s3879_s19 = scalar_lea.vmem %s2876_s14, 320  ;;  %p3884_p1 = scmp.lt.s32.totalorder %s2876_s14, %s2876_s14 }
 0xc4f   :  { %p3880_p0 = scmp.ne.s32.totalorder %s2876_s14, %s3879_s19  ;;  %p3885_p2 = scmp.lt.s32.totalorder %s3879_s19, %s3879_s19 }
 0xc51   :  { %p3886_p3 = por %p3885_p2, %p3884_p1 }
 0xc52   :  { %v3638_v59 = vpop.eup %3637 }
 0xc53   :  { %p3887_p4 = pnand %p3886_p3, %p3880_p0 }
 0xcb9   :  { %v4481_v39 = vpop.permute.xlu1 %1607 }
 0xcba   :  { %2915 = vmatmul.mubr.msk.f32.vlgmr.msra.gmra.mrb[8].mxu1 %vm189_vm0, %v4481_v39 }
 0xcbb   :  { %3297 = vmatpush1.bf16.msra.mxu1 %v4321_v21  ;;  %1746 = vmatprep.mubr.f32.mxu1 %v3922_v0 }
 0xcbc   :  { %3299 = vmatprep.subr.bf16.mxu1 %v4324_v26 }
 0xcbd   :  { %v1049_v50 = vpop.permute.xlu1 %1048 }
 0xcbe   :  { %v1051_v51 = vadd.f32 %v1049_v50, %v1045_v45  ;;  %v1968_v45 = vld [vmem:[#allocation11 + $0x78] sm:$0xff]  ;;  %v4540_v50 = vpack.c.bf16 %v1963_v38, %v1961_v33 }
 0xcbf   :  { %3301 = vmatpush1.bf16.msra.mxu1 %v4328_v48 }
 0xcc0   :  { %3639 = vtanh.f32 %v1051_v51  ;;  %3303 = vmatprep.subr.bf16.mxu1 %v4332_v49  ;;  %v4543_v51 = vpack.c.bf16 %v1968_v45, %v1966_v44 }
 0xcc3   :  { %3305 = vmatpush1.bf16.msra.mxu1 %v4335_v61 }
 0xcc4   :  { %3307 = vmatprep.subr.bf16.mxu1 %v4338_v1 }
 0xcc7   :  { %3309 = vmatpush1.bf16.msra.mxu1 %v4341_v11 }
 0xcc8   :  { %3343 = vmatprep.subr.bf16.mxu1 %v4494_v62 }
 0xcca   :  { %v3640_v2 = vpop.eup %3639  ;;  %2916 = vmatmul.mubr.msk.f32.vlgmr.msra.gmra.mrb[8].mxu1 %vm189_vm0, %v4388_v46  ;;  %v4517_v46 = vpack.c.bf16 %v1984_v25, %v1982_v30 }
 0xccb   :  { %3345 = vmatpush1.bf16.msra.mxu1 %v4497_v12  ;;  %2050 = vmatprep.mubr.f32.mxu1 %v3922_v0  ;;  %v4508_v13 = vmul.f32 %v3640_v2, %v3638_v59 }
 0xccc   :  { %3347 = vmatprep.subr.bf16.mxu1 %v4500_v34 }
 0xccf   :  { %3349 = vmatpush1.bf16.msra.mxu1 %v4505_v10 }
 0xcd0   :  { %3351 = vmatprep.subr.bf16.mxu1 %v4511_v54 }
 0xcd3   :  { %3353 = vmatpush1.bf16.msra.mxu1 %v4514_v4 }
 0xcd4   :  { %3355 = vmatprep.subr.bf16.mxu1 %v4517_v46 }
 0xcd7   :  { %3357 = vmatpush1.bf16.msra.mxu1 %v4520_v5 }
 0xcd8   :  { %3359 = vmatprep.subr.bf16.mxu1 %v4523_v15 }
 0xcda   :  { %2051 = vmatmul.mubr.f32.vlgmr.msra.gmra.mrb[10].mxu1 %v3922_v0 }
 0xcdb   :  { %3361 = vmatpush1.bf16.msra.mxu1 %v4526_v35  ;;  %2121 = vmatprep.mubr.f32.mxu1 %v3922_v0 }
 0xcdc   :  { %3363 = vmatprep.subr.bf16.mxu1 %v4529_v9 }
 0xcdf   :  { %3365 = vmatpush1.bf16.msra.mxu1 %v4533_v47 }
 0xce0   :  { %3367 = vmatprep.subr.bf16.mxu1 %v4537_v32 }
 0xce3   :  { %3369 = vmatpush1.bf16.msra.mxu1 %v4540_v50 }
 0xce4   :  { %3371 = vmatprep.subr.bf16.mxu1 %v4543_v51 }
 0xce7   :  { %3373 = vmatpush1.bf16.msra.mxu1 %v4546_v63 }
 0xce8   :  { %3407 = vmatprep.subr.bf16.mxu1 %v4494_v62 }
 0xcea   :  { %2923 = vmatmul.mubr.msk.f32.vlgmr.msra.gmra.mrb[10].mxu1 %vm189_vm0, %v4381_v53 }
 0xceb   :  { %3409 = vmatpush1.bf16.msra.mxu1 %v4497_v12  ;;  %2403 = vmatprep.mubr.f32.mxu1 %v3922_v0 }
 0xcec   :  { %3411 = vmatprep.subr.bf16.mxu1 %v4500_v34 }
 0xcef   :  { %3413 = vmatpush1.bf16.msra.mxu1 %v4505_v10 }
 0xcf0   :  { %3415 = vmatprep.subr.bf16.mxu1 %v4511_v54 }
 0xcf3   :  { %3417 = vmatpush1.bf16.msra.mxu1 %v4514_v4 }
 0xcf4   :  { %3419 = vmatprep.subr.bf16.mxu1 %v4517_v46 }
 0xcf7   :  { %3421 = vmatpush1.bf16.msra.mxu1 %v4520_v5 }
 0xcf8   :  { %3423 = vmatprep.subr.bf16.mxu1 %v4523_v15 }
 0xd9d   :  { %v1748_v6 = vpop.f32.mrb[8].mxu1 }
 0xd9e   :  { %v1753_v53 = vadd.f32 %v1748_v6, %v4363_v37  ;;  %v1750_v7 = vpop.f32.mrb[9].mxu1 }
 0xd9f   :  { %v1754_v8 = vadd.f32 %v1750_v7, %v4367_v42 }
 0xda0   :  { %v2917_v20 = vmul.f32 -1.442695, %v1753_v53 }
 0xda1   :  { %v2918_v40 = vmul.f32 -1.442695, %v1754_v8 }
 0xda2   :  { %3641 = vpow2.f32 %v2917_v20 }
 0xda3   :  { %3643 = vtanh.f32 %v1754_v8 }
 0xdac   :  { %v3642_v55 = vpop.eup %3641 }
 0xdad   :  { %v1758_v59 = vadd.f32 1.0, %v3642_v55  ;;  %v3644_v22 = vpop.eup %3643 }
 0xdaf   :  { %3645 = vrcp.f32 %v1758_v59 }
 0xdb9   :  { %v3646_v2 = vpop.eup %3645 }
 0xdba   :  { %v1769_v16 = vmul.f32 %v3646_v2, %v3644_v22  ;;  %v1768_v29 = vmul.f32 %v3646_v2, %v4475_v27 }
 0xdbc   :  { %1771 = vrot.lane.b32.xlu0 %v1769_v16, %s3917_s7 }
 0xdbd   :  { %v2123_v30 = vpop.f32.mrb[10].mxu1 }
 0xdbe   :  { %v2139_v25 = vadd.f32 %v4568_v23, %v2123_v30  ;;  %v2125_v58 = vpop.f32.mrb[11].mxu1 }
 0xdbf   :  { %v2140_v28 = vadd.f32 %v4573_v3, %v2125_v58 }
 0xdc0   :  { %v2924_v52 = vmul.f32 -1.442695, %v2139_v25 }
 0xdc1   :  { %v2925_v45 = vmul.f32 -1.442695, %v2140_v28 }
 0xdc2   :  { %3647 = vpow2.f32 %v2924_v52 }
 0xdc3   :  { %3649 = vtanh.f32 %v2140_v28 }
 0xdcc   :  { %v3648_v17 = vpop.eup %3647 }
 0xdcd   :  { %v2144_v19 = vadd.f32 1.0, %v3648_v17  ;;  %v3650_v31 = vpop.eup %3649 }
 0xdcf   :  { %3651 = vrcp.f32 %v2144_v19 }
 0xdd0   :  { %3653 = vpow2.f32 %v2918_v40 }
 0xdd9   :  { %v3652_v18 = vpop.eup %3651 }
 0xdda   :  { %v2155_v24 = vmul.f32 %v3652_v18, %v3650_v31  ;;  %v3654_v14 = vpop.eup %3653  ;;  %v2154_v6 = vmul.f32 0.0, %v3652_v18 }
 0xddb   :  { %v1765_v41 = vadd.f32 1.0, %v3654_v14 }
 0xddc   :  { %2157 = vrot.lane.b32.xlu0 %v2155_v24, %s3917_s7 }
 0xddd   :  { %3655 = vrcp.f32 %v1765_v41 }
 0xde0   :  { %1854 = vrot.lane.b32.xlu0 %v4508_v13, %s3917_s7 }
 0xde7   :  { %v3656_v38 = vpop.eup %3655 }
 0xe2e   :  { %v1772_v43 = vpop.permute.xlu0 %1771 }
 0xe2f   :  { %v4580_v33 = vadd.f32 %v1772_v43, %v1768_v29 }
 0xe31   :  { %3657 = vtanh.f32 %v4580_v33 }
 0xe32   :  { %3659 = vpow2.f32 %v2925_v45 }
 0xe3b   :  { %v3658_v44 = vpop.eup %3657 }
 0xe3c   :  { %v1776_v56 = vmul.f32 %v3658_v44, %v3656_v38  ;;  %v3660_v13 = vpop.eup %3659 }
 0xe3d   :  { %v2151_v57 = vadd.f32 1.0, %v3660_v13 }
 0xe3e   :  { %1778 = vrot.lane.b32.xlu1 %v1776_v56, %s3917_s7 }
 0xe3f   :  { %3661 = vrcp.f32 %v2151_v57 }
 0xe49   :  { %v3662_v27 = vpop.eup %3661 }
 0xe4e   :  { %v2158_v53 = vpop.permute.xlu0 %2157 }
 0xe4f   :  { %v4584_v7 = vadd.f32 %v2158_v53, %v2154_v6 }
 0xe51   :  { %3663 = vtanh.f32 %v4584_v7 }
 0xe52   :  { %v1855_v59 = vpop.permute.xlu0 %1854 }
 0xe5b   :  { %v3664_v20 = vpop.eup %3663 }
 0xe5c   :  { %v2162_v8 = vmul.f32 %v3664_v20, %v3662_v27 }
 0xe5e   :  { %2164 = vrot.lane.b32.xlu1 %v2162_v8, %s3917_s7 }
 0xeb0   :  { %v4588_v55 = vpop.permute.xlu1 %1778 }
 0xeb1   :  { %2919 = vmatmul.mubr.msk.f32.vlgmr.msra.gmra.mrb[8].mxu0 %vm189_vm0, %v4588_v55 }
 0xeb2   :  { %3329 = vmatpush1.bf16.msra.mxu0 %v4321_v21  ;;  %1922 = vmatprep.mubr.f32.mxu0 %v3922_v0 }
 0xeb3   :  { %3331 = vmatprep.subr.bf16.mxu0 %v4324_v26 }
 0xeb6   :  { %3333 = vmatpush1.bf16.msra.mxu0 %v4328_v48 }
 0xeb7   :  { %3335 = vmatprep.subr.bf16.mxu0 %v4332_v49 }
 0xeba   :  { %3337 = vmatpush1.bf16.msra.mxu0 %v4335_v61 }
 0xebb   :  { %3339 = vmatprep.subr.bf16.mxu0 %v4338_v1 }
 0xebe   :  { %3341 = vmatpush1.bf16.msra.mxu0 %v4341_v11 }
 0xebf   :  { %3375 = vmatprep.subr.bf16.mxu0 %v4494_v62 }
 0xec1   :  { %2920 = vmatmul.mubr.msk.f32.vlgmr.msra.gmra.mrb[8].mxu0 %vm189_vm0, %v1855_v59 }
 0xec2   :  { %3377 = vmatpush1.bf16.msra.mxu0 %v4497_v12  ;;  %2232 = vmatprep.mubr.f32.mxu0 %v3922_v0 }
 0xec3   :  { %3379 = vmatprep.subr.bf16.mxu0 %v4500_v34 }
 0xec6   :  { %3381 = vmatpush1.bf16.msra.mxu0 %v4505_v10 }
 0xec7   :  { %3383 = vmatprep.subr.bf16.mxu0 %v4511_v54 }
 0xeca   :  { %3385 = vmatpush1.bf16.msra.mxu0 %v4514_v4 }
 0xecb   :  { %3387 = vmatprep.subr.bf16.mxu0 %v4517_v46 }
 0xece   :  { %3389 = vmatpush1.bf16.msra.mxu0 %v4520_v5 }
 0xecf   :  { %3391 = vmatprep.subr.bf16.mxu0 %v4523_v15 }
 0xed0   :  { %v2165_v21 = vpop.permute.xlu1 %2164 }
 0xed1   :  { %2854 = vst.msk [vmem:[#allocation14] sm:$0xf] %vm2853_vm1, %v2165_v21  ;;  %2926 = vmatmul.mubr.msk.f32.vlgmr.msra.gmra.mrb[10].mxu0 %vm189_vm0, %v2165_v21 }
 0xed2   :  { %3393 = vmatpush1.bf16.msra.mxu0 %v4526_v35  ;;  %2303 = vmatprep.mubr.f32.mxu0 %v3922_v0 }
 0xed3   :  { %3395 = vmatprep.subr.bf16.mxu0 %v4529_v9 }
 0xed6   :  { %3397 = vmatpush1.bf16.msra.mxu0 %v4533_v47 }
 0xed7   :  { %3399 = vmatprep.subr.bf16.mxu0 %v4537_v32 }
 0xeda   :  { %3401 = vmatpush1.bf16.msra.mxu0 %v4540_v50 }
 0xedb   :  { %3403 = vmatprep.subr.bf16.mxu0 %v4543_v51 }
 0xede   :  { %3405 = vmatpush1.bf16.msra.mxu0 %v4546_v63 }
 0xedf   :  { %3439 = vmatprep.subr.bf16.mxu0 %v4494_v62 }
 0xee1   :  { %2927 = vmatmul.mubr.msk.f32.vlgmr.msra.gmra.mrb[10].mxu0 %vm189_vm0, %v4448_v36 }
 0xee2   :  { %3441 = vmatpush1.bf16.msra.mxu0 %v4497_v12  ;;  %2574 = vmatprep.mubr.f32.mxu0 %v3922_v0 }
 0xee3   :  { %3443 = vmatprep.subr.bf16.mxu0 %v4500_v34 }
 0xee6   :  { %3445 = vmatpush1.bf16.msra.mxu0 %v4505_v10 }
 0xee7   :  { %3447 = vmatprep.subr.bf16.mxu0 %v4511_v54 }
 0xeea   :  { %3449 = vmatpush1.bf16.msra.mxu0 %v4514_v4 }
 0xeeb   :  { %3451 = vmatprep.subr.bf16.mxu0 %v4517_v46 }
 0xeee   :  { %3453 = vmatpush1.bf16.msra.mxu0 %v4520_v5 }
 0xeef   :  { %3455 = vmatprep.subr.bf16.mxu0 %v4523_v15 }
 0xf94   :  { %v1924_v26 = vpop.f32.mrb[8].mxu0 }
 0xf95   :  { %v1929_v48 = vadd.f32 %v1924_v26, %v4363_v37  ;;  %v1926_v49 = vpop.f32.mrb[9].mxu0 }
 0xf96   :  { %v4635_v1 = vadd.f32 %v1926_v49, %v4367_v42 }
 0xf97   :  { %v2921_v61 = vmul.f32 -1.442695, %v1929_v48 }
 0xf98   :  { %v2922_v8 = vmul.f32 -1.442695, %v4635_v1 }
 0xf99   :  { %3665 = vpow2.f32 %v2921_v61 }
 0xf9a   :  { %3667 = vtanh.f32 %v4635_v1 }
 0xfa3   :  { %v3666_v11 = vpop.eup %3665 }
 0xfa4   :  { %v1934_v36 = vadd.f32 1.0, %v3666_v11  ;;  %v3668_v60 = vpop.eup %3667 }
 0xfa6   :  { %3669 = vrcp.f32 %v1934_v36 }
 0xfb0   :  { %v4638_v22 = vpop.eup %3669 }
 0xfb1   :  { %v4641_v2 = vmul.f32 %v4638_v22, %v3668_v60  ;;  %v1944_v48 = vmul.f32 %v4638_v22, %v4580_v33 }
 0xfb4   :  { %v2305_v16 = vpop.f32.mrb[10].mxu0 }
 0xfb5   :  { %v2310_v37 = vadd.f32 %v2305_v16, %v4568_v23  ;;  %v2307_v30 = vpop.f32.mrb[11].mxu0 }
 0xfb6   :  { %v2311_v42 = vadd.f32 %v2307_v30, %v4573_v3 }
 0xfb7   :  { %v2928_v25 = vmul.f32 -1.442695, %v2310_v37 }
 0xfb8   :  { %v2929_v31 = vmul.f32 -1.442695, %v2311_v42 }
 0xfb9   :  { %3671 = vpow2.f32 %v2928_v25 }
 0xfba   :  { %3673 = vtanh.f32 %v2311_v42 }
 0xfc3   :  { %v3672_v58 = vpop.eup %3671 }
 0xfc4   :  { %v2315_v52 = vadd.f32 1.0, %v3672_v58  ;;  %v3674_v28 = vpop.eup %3673 }
 0xfc6   :  { %3675 = vrcp.f32 %v2315_v52 }
 0xfc7   :  { %3677 = vpow2.f32 %v2929_v31 }
 0xfd0   :  { %v3676_v17 = vpop.eup %3675 }
 0xfd1   :  { %v2326_v19 = vmul.f32 %v3676_v17, %v3674_v28  ;;  %v3678_v18 = vpop.eup %3677  ;;  %v2325_v40 = vmul.f32 %v3676_v17, %v4584_v7 }
 0xfd2   :  { %v2322_v24 = vadd.f32 1.0, %v3678_v18 }
 0xfd3   :  { %2328 = vrot.lane.b32.xlu0 %v2326_v19, %s3917_s7 }
 0xfd4   :  { %3679 = vrcp.f32 %v2322_v24 }
 0xfde   :  { %v3680_v29 = vpop.eup %3679 }
0x1045   :  { %v2329_v14 = vpop.permute.xlu0 %2328 }
0x1046   :  { %v2331_v41 = vadd.f32 %v2329_v14, %v2325_v40 }
0x1048   :  { %3681 = vtanh.f32 %v2331_v41 }
0x1052   :  { %v3682_v43 = vpop.eup %3681 }
0x1053   :  { %v2333_v38 = vmul.f32 %v3682_v43, %v3680_v29 }
0x1055   :  { %2335 = vrot.lane.b32.xlu1 %v2333_v38, %s3917_s7 }
0x10c7   :  { %v2336_v44 = vpop.permute.xlu1 %2335 }
0x10c8   :  { %2857 = vst.msk [vmem:[#allocation14 + $0x4] sm:$0xf] %vm2853_vm1, %v2336_v44  ;;  %2930 = vmatmul.mubr.msk.f32.vlgmr.msra.gmra.mrb[12].mxu1 %vm189_vm0, %v2336_v44 }
0x10c9   :  { %3425 = vmatpush1.bf16.msra.mxu1 %v4526_v35  ;;  %2474 = vmatprep.mubr.f32.mxu1 %v3922_v0 }
0x10ca   :  { %3427 = vmatprep.subr.bf16.mxu1 %v4529_v9 }
0x10cd   :  { %3429 = vmatpush1.bf16.msra.mxu1 %v4533_v47 }
0x10ce   :  { %3431 = vmatprep.subr.bf16.mxu1 %v4537_v32 }
0x10d1   :  { %3433 = vmatpush1.bf16.msra.mxu1 %v4540_v50 }
0x10d2   :  { %3435 = vmatprep.subr.bf16.mxu1 %v4543_v51 }
0x10d5   :  { %3437 = vmatpush1.bf16.msra.mxu1 %v4546_v63 }
0x10d6   :  { %3471 = vmatprep.subr.bf16.mxu1 %v4494_v62 }
0x10d8   :  { %2931 = vmatmul.mubr.msk.f32.vlgmr.msra.gmra.mrb[12].mxu1 %vm189_vm0, %v4481_v39 }
0x10d9   :  { %3473 = vmatpush1.bf16.msra.mxu1 %v4497_v12  ;;  %2745 = vmatprep.mubr.f32.mxu1 %v3922_v0 }
0x10da   :  { %3475 = vmatprep.subr.bf16.mxu1 %v4500_v34 }
0x10dd   :  { %3477 = vmatpush1.bf16.msra.mxu1 %v4505_v10 }
0x10de   :  { %3479 = vmatprep.subr.bf16.mxu1 %v4511_v54 }
0x10e1   :  { %3481 = vmatpush1.bf16.msra.mxu1 %v4514_v4 }
0x10e2   :  { %3483 = vmatprep.subr.bf16.mxu1 %v4517_v46 }
0x10e5   :  { %3485 = vmatpush1.bf16.msra.mxu1 %v4520_v5 }
0x10e6   :  { %3487 = vmatprep.subr.bf16.mxu1 %v4523_v15 }
0x11ab   :  { %v2476_v62 = vpop.f32.mrb[12].mxu1 }
0x11ac   :  { %v2481_v39 = vadd.f32 %v2476_v62, %v4568_v23  ;;  %v2478_v12 = vpop.f32.mrb[13].mxu1 }
0x11ad   :  { %v2482_v34 = vadd.f32 %v2478_v12, %v4573_v3 }
0x11ae   :  { %v2932_v45 = vmul.f32 -1.442695, %v2481_v39 }
0x11af   :  { %v2933_v46 = vmul.f32 -1.442695, %v2482_v34 }
0x11b0   :  { %3683 = vpow2.f32 %v2932_v45 }
0x11b1   :  { %3685 = vtanh.f32 %v2482_v34 }
0x11ba   :  { %v3684_v56 = vpop.eup %3683 }
0x11bb   :  { %v2486_v10 = vadd.f32 1.0, %v3684_v56  ;;  %v3686_v54 = vpop.eup %3685 }
0x11bd   :  { %3687 = vrcp.f32 %v2486_v10 }
0x11be   :  { %3689 = vpow2.f32 %v2933_v46 }
0x11c7   :  { %v3688_v4 = vpop.eup %3687 }
0x11c8   :  { %v2497_v13 = vmul.f32 %v3688_v4, %v3686_v54  ;;  %v3690_v5 = vpop.eup %3689  ;;  %v2496_v57 = vmul.f32 %v3688_v4, %v2331_v41 }
0x11c9   :  { %v2493_v15 = vadd.f32 1.0, %v3690_v5 }
0x11ca   :  { %2499 = vrot.lane.b32.xlu0 %v2497_v13, %s3917_s7 }
0x11cb   :  { %3691 = vrcp.f32 %v2493_v15 }
0x11d5   :  { %v3692_v7 = vpop.eup %3691 }
0x123c   :  { %v2500_v6 = vpop.permute.xlu0 %2499 }
0x123d   :  { %v2502_v53 = vadd.f32 %v2500_v6, %v2496_v57 }
0x123f   :  { %3693 = vtanh.f32 %v2502_v53 }
0x1240   :  { %3695 = vpow2.f32 %v2922_v8 }
0x1249   :  { %v3694_v27 = vpop.eup %3693 }
0x124a   :  { %v2504_v20 = vmul.f32 %v3694_v27, %v3692_v7  ;;  %v3696_v59 = vpop.eup %3695 }
0x124b   :  { %v1941_v26 = vadd.f32 1.0, %v3696_v59 }
0x124c   :  { %2506 = vrot.lane.b32.xlu1 %v2504_v20, %s3917_s7 }
0x124d   :  { %3697 = vrcp.f32 %v1941_v26 }
0x1250   :  { %1947 = vrot.lane.b32.xlu1 %v4641_v2, %s3917_s7 }
0x1257   :  { %v3698_v1 = vpop.eup %3697 }
0x12be   :  { %v2507_v21 = vpop.permute.xlu1 %2506 }
0x12bf   :  { %2860 = vst.msk [vmem:[#allocation14 + $0x8] sm:$0xf] %vm2853_vm1, %v2507_v21  ;;  %2934 = vmatmul.mubr.msk.f32.vlgmr.msra.gmra.mrb[12].mxu0 %vm189_vm0, %v2507_v21 }
0x12c0   :  { %3457 = vmatpush1.bf16.msra.mxu0 %v4526_v35  ;;  %2645 = vmatprep.mubr.f32.mxu0 %v3922_v0 }
0x12c1   :  { %3459 = vmatprep.subr.bf16.mxu0 %v4529_v9 }
0x12c2   :  { %v1948_v49 = vpop.permute.xlu1 %1947 }
0x12c3   :  { %v1950_v61 = vadd.f32 %v1948_v49, %v1944_v48 }
0x12c4   :  { %3461 = vmatpush1.bf16.msra.mxu0 %v4533_v47 }
0x12c5   :  { %3699 = vtanh.f32 %v1950_v61  ;;  %3463 = vmatprep.subr.bf16.mxu0 %v4537_v32 }
0x12c8   :  { %3465 = vmatpush1.bf16.msra.mxu0 %v4540_v50 }
0x12c9   :  { %3467 = vmatprep.subr.bf16.mxu0 %v4543_v51 }
0x12cc   :  { %3469 = vmatpush1.bf16.msra.mxu0 %v4546_v63 }
0x12cf   :  { %v3700_v11 = vpop.eup %3699  ;;  %2935 = vmatmul.mubr.msk.f32.vlgmr.msra.gmra.mrb[12].mxu0 %vm189_vm0, %v4588_v55 }
0x12d0   :  { %v1952_v33 = vmul.f32 %v3700_v11, %v3698_v1 }
0x12d2   :  { %2753 = vrot.lane.b32.xlu1 %v1952_v33, %s3917_s7 }
0x1344   :  { %v2754_v41 = vpop.permute.xlu1 %2753 }
0x13a2   :  { %v2647_v36 = vpop.f32.mrb[12].mxu0 }
0x13a3   :  { %v2652_v60 = vadd.f32 %v2647_v36, %v4568_v23  ;;  %v2649_v22 = vpop.f32.mrb[13].mxu0 }
0x13a4   :  { %v2653_v16 = vadd.f32 %v2649_v22, %v4573_v3 }
0x13a5   :  { %v2936_v2 = vmul.f32 -1.442695, %v2652_v60 }
0x13a6   :  { %v2937_v55 = vmul.f32 -1.442695, %v2653_v16 }
0x13a7   :  { %3701 = vpow2.f32 %v2936_v2 }
0x13a8   :  { %3703 = vtanh.f32 %v2653_v16 }
0x13b1   :  { %v3702_v37 = vpop.eup %3701 }
0x13b2   :  { %v2657_v30 = vadd.f32 1.0, %v3702_v37  ;;  %v3704_v25 = vpop.eup %3703 }
0x13b4   :  { %3705 = vrcp.f32 %v2657_v30 }
0x13b5   :  { %3707 = vpow2.f32 %v2937_v55 }
0x13be   :  { %v3706_v42 = vpop.eup %3705 }
0x13bf   :  { %v2668_v58 = vmul.f32 %v3706_v42, %v3704_v25  ;;  %v3708_v52 = vpop.eup %3707  ;;  %v2667_v17 = vmul.f32 %v3706_v42, %v2502_v53 }
0x13c0   :  { %v2664_v28 = vadd.f32 1.0, %v3708_v52 }
0x13c1   :  { %2670 = vrot.lane.b32.xlu0 %v2668_v58, %s3917_s7 }
0x13c2   :  { %3709 = vrcp.f32 %v2664_v28 }
0x13cc   :  { %v3710_v18 = vpop.eup %3709 }
0x1433   :  { %v2671_v19 = vpop.permute.xlu0 %2670 }
0x1434   :  { %v2673_v31 = vadd.f32 %v2671_v19, %v2667_v17 }
0x1436   :  { %3711 = vtanh.f32 %v2673_v31 }
0x1440   :  { %v3712_v24 = vpop.eup %3711 }
0x1441   :  { %v2675_v40 = vmul.f32 %v3712_v24, %v3710_v18 }
0x1443   :  { %2677 = vrot.lane.b32.xlu0 %v2675_v40, %s3917_s7 }
0x14b5   :  { %v2678_v14 = vpop.permute.xlu0 %2677 }
0x14b6   :  { %2863 = vst.msk [vmem:[#allocation14 + $0xc] sm:$0xf] %vm2853_vm1, %v2678_v14  ;;  %2938 = vmatmul.mubr.msk.f32.vlgmr.msra.gmra.mrb[14].mxu1 %vm189_vm0, %v2678_v14 }
0x14b7   :  { %3489 = vmatpush1.bf16.msra.mxu1 %v4526_v35  ;;  %2821 = vmatprep.mubr.f32.mxu1 %v3922_v0 }
0x14b8   :  { %3491 = vmatprep.subr.bf16.mxu1 %v4529_v9 }
0x14bb   :  { %3493 = vmatpush1.bf16.msra.mxu1 %v4533_v47 }
0x14bc   :  { %3495 = vmatprep.subr.bf16.mxu1 %v4537_v32 }
0x14bf   :  { %3497 = vmatpush1.bf16.msra.mxu1 %v4540_v50 }
0x14c0   :  { %3499 = vmatprep.subr.bf16.mxu1 %v4543_v51 }
0x14c3   :  { %3501 = vmatpush1.bf16.msra.mxu1 %v4546_v63 }
0x14c6   :  { %2939 = vmatmul.mubr.msk.f32.vlgmr.msra.gmra.mrb[14].mxu1 %vm189_vm0, %v2754_v41 }
0x1599   :  { %v2823_v29 = vpop.f32.mrb[14].mxu1 }
0x159a   :  { %v2828_v35 = vadd.f32 %v2823_v29, %v4568_v23  ;;  %v2825_v43 = vpop.f32.mrb[15].mxu1 }
0x159b   :  { %v2829_v9 = vadd.f32 %v2825_v43, %v4573_v3 }
0x159c   :  { %v2940_v0 = vmul.f32 -1.442695, %v2828_v35 }
0x159d   :  { %v2941_v63 = vmul.f32 -1.442695, %v2829_v9 }
0x159e   :  { %3713 = vpow2.f32 %v2940_v0 }
0x159f   :  { %3715 = vtanh.f32 %v2829_v9 }
0x15a8   :  { %v3714_v47 = vpop.eup %3713 }
0x15a9   :  { %v2833_v38 = vadd.f32 1.0, %v3714_v47  ;;  %v3716_v32 = vpop.eup %3715 }
0x15ab   :  { %3717 = vrcp.f32 %v2833_v38 }
0x15ac   :  { %3719 = vpow2.f32 %v2941_v63 }
0x15b5   :  { %v3718_v50 = vpop.eup %3717 }
0x15b6   :  { %v2844_v51 = vmul.f32 %v3718_v50, %v3716_v32  ;;  %v3720_v44 = vpop.eup %3719  ;;  %v2843_v39 = vmul.f32 %v3718_v50, %v2673_v31 }
0x15b7   :  { %v2840_v62 = vadd.f32 1.0, %v3720_v44 }
0x15b8   :  { %2846 = vrot.lane.b32.xlu0 %v2844_v51, %s3917_s7 }
0x15b9   :  { %3721 = vrcp.f32 %v2840_v62 }
0x15c3   :  { %v3722_v45 = vpop.eup %3721 }
0x162a   :  { %v2847_v23 = vpop.permute.xlu0 %2846 }
0x162b   :  { %v2849_v12 = vadd.f32 %v2847_v23, %v2843_v39 }
0x162d   :  { %3723 = vtanh.f32 %v2849_v12 }
0x1637   :  { %v3724_v3 = vpop.eup %3723 }
0x1638   :  { %v2851_v34 = vmul.f32 %v3724_v3, %v3722_v45 }
0x163a   :  { %2865 = vrot.lane.b32.xlu1 %v2851_v34, %s3917_s7 }
0x16ac   :  { %v2866_v56 = vpop.permute.xlu1 %2865 }
0x16ad   :  { %2869 = vst.msk [vmem:[#allocation14 + $0x10] sm:$0xf] %vm2853_vm1, %v2866_v56 }
0x16ae   :  { %3890 = shalt.err (!%p3887_p4)
}
0x16af   :  { %s3891_s22 = scalar_lea.hbm %s4737_s10, 320 }
0x16b0   :  { %p3892_p5 = scmp.ne.s32.totalorder %s4737_s10, %s3891_s22  ;;  %p3895_p6 = scmp.lt.u32.totalorder %s3891_s22, %s4737_s10 }
0x16b2   :  { %p3897_p7 = pnand %p3895_p6, %p3892_p5 }
0x16b4   :  { %3900 = shalt.err (!%p3897_p7)
}
0x16b5   :  { %2881 = dma.vmem_to_hbm [thread:$0]  %s2876_s14, 320, %s4737_s10, [#allocation4], %s3917_s7, %s3917_s7, %s3918_s30  }
0x16b6   :  { %3909 = dma.done.wait [#allocation4], 320  }
0x16b7   :  { %3910 = vsyncadd [#allocation4], 4294966976 }
0x16b8   :  { %2885 = vsyncpa [#allocation3], 1 }
0x16b9   :  { %2886 = vsyncpa [#allocation6], 1 }
0x16ba   :  { %2887 = vsyncpa [#allocation9], 1 }
0x16bb   :  { %2888 = vsyncpa [#allocation12], 1 }
0x16bc   :  { %2889 = vsyncpa [#allocation4], 1 }

</bundles_post_ra>
